<compile_context>
chip_gen: v5e
topology: v5e:2x2
jax: 0.10.0
libtpu: 0.0.40
codegen_flags: <defaults>
</compile_context>

<pallas_src>
import functools

import jax
import jax.numpy as jnp
from jax import lax
from jax.experimental import pallas as pl
from jax.experimental.pallas import tpu as pltpu


def _gumbel_softmax_kernel(seed_ref, x_ref, o_ref, *, tau, hard):
    tm, c = x_ref.shape

    # ---- Stateless per-element uniform noise (murmur3-style hash) ----------
    # Counter = global element index (tile offset folded in via program_id), so
    # different grid tiles never replay the same stream for a given seed.
    row0 = pl.program_id(0) * tm
    rows = (lax.broadcasted_iota(jnp.int32, (tm, c), 0) + row0).astype(jnp.uint32)
    cols = lax.broadcasted_iota(jnp.int32, (tm, c), 1).astype(jnp.uint32)
    counter = rows * jnp.uint32(c) + cols

    seed_u = seed_ref[0].astype(jnp.uint32)
    key = (seed_u ^ jnp.uint32(0x9E3779B9)) * jnp.uint32(0x85EBCA6B) + jnp.uint32(0x68BC21EB)

    h = counter * jnp.uint32(0x9E3779B9) + key
    h = h ^ (h >> 16)
    h = h * jnp.uint32(0x85EBCA6B)
    h = h ^ (h >> 13)
    h = h * jnp.uint32(0xC2B2AE35)
    h = h ^ (h >> 16)

    # 24-bit uniform in [0, 1); int32 convert keeps the path Mosaic-safe.
    u = (h >> 8).astype(jnp.int32).astype(jnp.float32) * jnp.float32(1.0 / (1 << 24))
    u = jnp.maximum(u, jnp.float32(1e-10))          # guard log(0)

    e_noise = -jnp.log(u)                           # E ~ Exp(1);  g = -log(E)

    x = x_ref[...].astype(jnp.float32)

    if hard:
        # Straight-through forward value only needs argmax(logits + g); skip
        # the softmax (exp / sum / reciprocal) entirely.  tau > 0 does not
        # change the argmax.
        z = x - jnp.log(e_noise)
        m = jnp.max(z, axis=-1, keepdims=True)
        iota = lax.broadcasted_iota(jnp.int32, (tm, c), 1)
        idx = jnp.min(jnp.where(z == m, iota, jnp.int32(c)), axis=-1, keepdims=True)
        y = jnp.where(iota == idx, jnp.float32(1.0), jnp.float32(0.0))
    elif tau == 1.0:
        # tau == 1 specialization: softmax(x - log E) == (exp(x - m)/E) / sum,
        # i.e. one log per element instead of two (EUP is the binding unit).
        m = jnp.max(x, axis=-1, keepdims=True)
        num = jnp.exp(x - m) / e_noise
        den = jnp.sum(num, axis=-1, keepdims=True)
        y = num / den
    else:
        # General path: z = (x + g)/tau with a numerically stable softmax.
        z = (x - jnp.log(e_noise)) * jnp.float32(1.0 / float(tau))
        m = jnp.max(z, axis=-1, keepdims=True)
        e = jnp.exp(z - m)
        s = jnp.sum(e, axis=-1, keepdims=True)
        y = e / s

    o_ref[...] = y.astype(o_ref.dtype)


def _choose_row_tile(rows, cols, in_bytes, out_bytes):
    """Pick a row-tile size: big enough to pipeline, small enough for VMEM."""
    budget = 8 * 1024 * 1024                      # ~8 MiB for in+out, 2x-buffered
    per_row = 2 * cols * (in_bytes + out_bytes)
    tm = budget // max(per_row, 1)
    tm = max(16, min(int(tm), 1024))
    if tm >= rows:
        return rows                               # single full block
    align = 16 if min(in_bytes, out_bytes) < 4 else 8
    return max(align, tm - tm % align)


def gumbel_softmax(logits, *, seed=0, tau=1.0, hard=False, dim=-1):
    """Pallas-backed equivalent of F.gumbel_softmax(logits, tau, hard, dim)."""
    ndim = logits.ndim
    dim = dim % ndim

    if dim != ndim - 1:
        perm = tuple(i for i in range(ndim) if i != dim) + (dim,)
        inv_perm = tuple(sorted(range(ndim), key=lambda i: perm[i]))
        x = jnp.transpose(logits, perm)
    else:
        inv_perm = None
        x = logits

    t_shape = x.shape
    c = t_shape[-1]
    x2d = x.reshape(-1, c)
    r = x2d.shape[0]

    in_bytes = x2d.dtype.itemsize
    out_bytes = logits.dtype.itemsize
    tm = _choose_row_tile(r, c, in_bytes, out_bytes)
    grid = (pl.cdiv(r, tm),)

    seed_arr = jnp.asarray([seed], dtype=jnp.int32)
    n = x2d.size
    transcendentals = 3 * n if (not hard and float(tau) != 1.0) else 2 * n
    cost = pl.CostEstimate(
        flops=20 * n,
        transcendentals=transcendentals,
        bytes_accessed=n * (in_bytes + out_bytes),
    )

    out2d = pl.pallas_call(
        functools.partial(_gumbel_softmax_kernel, tau=float(tau), hard=bool(hard)),
        grid=grid,
        out_shape=jax.ShapeDtypeStruct((r, c), logits.dtype),
        in_specs=[
            pl.BlockSpec(memory_space=pltpu.MemorySpace.SMEM),      # seed scalar
            pl.BlockSpec((tm, c), lambda i: (i, 0)),                # logits tile
        ],
        out_specs=pl.BlockSpec((tm, c), lambda i: (i, 0)),
        compiler_params=pltpu.CompilerParams(
            dimension_semantics=("parallel",),                      # 2 TCs on v7x
            vmem_limit_bytes=32 * 1024 * 1024,                      # tile budget << 32 MiB
        ),
        cost_estimate=cost,
    )(seed_arr, x2d)

    out = out2d.reshape(t_shape)
    if inv_perm is not None:
        out = jnp.transpose(out, inv_perm)
    return out


class GumbelSoftmax:
    """Mirror of the PyTorch module (no learnable parameters)."""

    def __init__(self, tau=1, hard=False, dim=-1):
        self.tau = tau
        self.hard = hard
        self.dim = dim

    def __call__(self, logits, seed=0):
        return gumbel_softmax(
            logits, seed=seed, tau=self.tau, hard=self.hard, dim=self.dim
        )


if __name__ == "__main__":
    key = jax.random.PRNGKey(0)
    logits = jax.random.normal(key, (2, 4, 16, 16), dtype=jnp.float32)

    # Default module config: tau=1, hard=False, dim=-1 (soft samples).
    soft = GumbelSoftmax(tau=1, hard=False, dim=-1)(logits, seed=0)
    soft = jax.block_until_ready(soft)
    assert soft.shape == logits.shape and soft.dtype == logits.dtype
    sums = jnp.sum(soft, axis=-1)
    assert bool(jnp.all(jnp.abs(sums - 1.0) < 1e-4))
    assert bool(jnp.all(soft >= 0.0)) and bool(jnp.all(soft <= 1.0))

    # hard=True: straight-through forward value is an exact one-hot per row.
    hard_out = GumbelSoftmax(tau=1, hard=True, dim=-1)(logits, seed=1)
    hard_out = jax.block_until_ready(hard_out)
    assert bool(jnp.all(jnp.sum(hard_out, axis=-1) == 1.0))
    assert bool(jnp.all((hard_out == 0.0) | (hard_out == 1.0)))

    # General path: tau != 1 and a non-last softmax axis.
    t_out = GumbelSoftmax(tau=0.5, hard=False, dim=1)(logits, seed=2)
    t_out = jax.block_until_ready(t_out)
    assert t_out.shape == logits.shape
    assert bool(jnp.all(jnp.abs(jnp.sum(t_out, axis=1) - 1.0) < 1e-4))

    print("KERNEL_OK")
</pallas_src>

<mosaic_0001>
module attributes {stable_mosaic.version = 11 : i64} {
  func.func @_gumbel_softmax_kernel(%arg0: i32, %arg1: memref<1xi32, #tpu.memory_space<smem>>, %arg2: memref<128x16xf32, #tpu.memory_space<vmem>>, %arg3: memref<128x16xf32, #tpu.memory_space<vmem>>) attributes {dimension_semantics = [#tpu.dimension_semantics<parallel>], iteration_bounds = array<i64: 1>, scalar_prefetch = 0 : i64, scratch_operands = 0 : i64, tpu.core_type = #tpu.core_type<tc>, window_params = [{transform_indices = @transform_0, window_bounds = array<i64: 1>}, {transform_indices = @transform_1, window_bounds = array<i64: 128, 16>}, {transform_indices = @transform_2, window_bounds = array<i64: 128, 16>}]} {
    %c128_i32 = arith.constant 128 : i32
    %0 = arith.muli %arg0, %c128_i32 : i32
    %1 = tpu.iota {dimensions = array<i32: 0>} : vector<128x16xi32>
    %2 = vector.broadcast %0 : i32 to vector<128x16xi32>
    %3 = arith.addi %1, %2 : vector<128x16xi32>
    %4 = tpu.iota {dimensions = array<i32: 1>} : vector<128x16xi32>
    %c16_i32 = arith.constant 16 : i32
    %5 = vector.broadcast %c16_i32 : i32 to vector<128x16xi32>
    %6 = arith.muli %3, %5 : vector<128x16xi32>
    %7 = arith.addi %6, %4 : vector<128x16xi32>
    %c0 = arith.constant 0 : index
    %8 = memref.load %arg1[%c0] : memref<1xi32, #tpu.memory_space<smem>>
    %c-1640531527_i32 = arith.constant -1640531527 : i32
    %9 = arith.xori %8, %c-1640531527_i32 : i32
    %c-2048144789_i32 = arith.constant -2048144789 : i32
    %10 = arith.muli %9, %c-2048144789_i32 : i32
    %c1757159915_i32 = arith.constant 1757159915 : i32
    %11 = arith.addi %10, %c1757159915_i32 : i32
    %c-1640531527_i32_0 = arith.constant -1640531527 : i32
    %12 = vector.broadcast %c-1640531527_i32_0 : i32 to vector<128x16xi32>
    %13 = arith.muli %7, %12 : vector<128x16xi32>
    %14 = vector.broadcast %11 : i32 to vector<128x16xi32>
    %15 = arith.addi %13, %14 : vector<128x16xi32>
    %c16_i32_1 = arith.constant 16 : i32
    %16 = vector.broadcast %c16_i32_1 : i32 to vector<128x16xi32>
    %17 = arith.shrui %15, %16 : vector<128x16xi32>
    %18 = arith.xori %15, %17 : vector<128x16xi32>
    %c-2048144789_i32_2 = arith.constant -2048144789 : i32
    %19 = vector.broadcast %c-2048144789_i32_2 : i32 to vector<128x16xi32>
    %20 = arith.muli %18, %19 : vector<128x16xi32>
    %c13_i32 = arith.constant 13 : i32
    %21 = vector.broadcast %c13_i32 : i32 to vector<128x16xi32>
    %22 = arith.shrui %20, %21 : vector<128x16xi32>
    %23 = arith.xori %20, %22 : vector<128x16xi32>
    %c-1028477387_i32 = arith.constant -1028477387 : i32
    %24 = vector.broadcast %c-1028477387_i32 : i32 to vector<128x16xi32>
    %25 = arith.muli %23, %24 : vector<128x16xi32>
    %c16_i32_3 = arith.constant 16 : i32
    %26 = vector.broadcast %c16_i32_3 : i32 to vector<128x16xi32>
    %27 = arith.shrui %25, %26 : vector<128x16xi32>
    %28 = arith.xori %25, %27 : vector<128x16xi32>
    %c8_i32 = arith.constant 8 : i32
    %29 = vector.broadcast %c8_i32 : i32 to vector<128x16xi32>
    %30 = arith.shrui %28, %29 : vector<128x16xi32>
    %31 = arith.sitofp %30 : vector<128x16xi32> to vector<128x16xf32>
    %cst = arith.constant 5.96046448E-8 : f32
    %32 = vector.broadcast %cst : f32 to vector<128x16xf32>
    %33 = arith.mulf %31, %32 : vector<128x16xf32>
    %cst_4 = arith.constant 1.000000e-10 : f32
    %34 = vector.broadcast %cst_4 : f32 to vector<128x16xf32>
    %35 = arith.maximumf %33, %34 : vector<128x16xf32>
    %36 = math.log %35 : vector<128x16xf32>
    %cst_5 = arith.constant 0.000000e+00 : f32
    %37 = vector.broadcast %cst_5 : f32 to vector<128x16xf32>
    %38 = arith.subf %37, %36 : vector<128x16xf32>
    %c0_6 = arith.constant 0 : index
    %c0_7 = arith.constant 0 : index
    %39 = vector.load %arg2[%c0_6, %c0_7] : memref<128x16xf32, #tpu.memory_space<vmem>>, vector<128x16xf32>
    %cst_8 = arith.constant dense<0xFF800000> : vector<128xf32>
    %40 = vector.multi_reduction <maximumf>, %39, %cst_8 [1] : vector<128x16xf32> to vector<128xf32>
    %41 = vector.shape_cast %40 : vector<128xf32> to vector<128x1xf32>
    %42 = vector.broadcast %41 : vector<128x1xf32> to vector<128x16xf32>
    %43 = arith.subf %39, %42 : vector<128x16xf32>
    %44 = math.exp %43 : vector<128x16xf32>
    %45 = arith.divf %44, %38 : vector<128x16xf32>
    %cst_9 = arith.constant dense<0.000000e+00> : vector<128xf32>
    %46 = vector.multi_reduction <add>, %45, %cst_9 [1] : vector<128x16xf32> to vector<128xf32>
    %47 = vector.shape_cast %46 : vector<128xf32> to vector<128x1xf32>
    %48 = vector.broadcast %47 : vector<128x1xf32> to vector<128x16xf32>
    %49 = arith.divf %45, %48 : vector<128x16xf32>
    %c0_10 = arith.constant 0 : index
    %c0_11 = arith.constant 0 : index
    %50 = vector.load %arg3[%c0_10, %c0_11] : memref<128x16xf32, #tpu.memory_space<vmem>>, vector<128x16xf32>
    tpu.vector_store %arg3[%c0_10, %c0_11], %49 {strides = array<i32>} : memref<128x16xf32, #tpu.memory_space<vmem>>, vector<128x16xf32>,
    return
  }
  func.func @transform_0(%arg0: i32) -> i32 {
    %c0_i32 = arith.constant 0 : i32
    %c0_i32_0 = arith.constant 0 : i32
    return %c0_i32 : i32
  }
  func.func @transform_1(%arg0: i32) -> (i32, i32) {
    %c0_i32 = arith.constant 0 : i32
    %c0_i32_0 = arith.constant 0 : i32
    return %arg0, %c0_i32 : i32, i32
  }
  func.func @transform_2(%arg0: i32) -> (i32, i32) {
    %c0_i32 = arith.constant 0 : i32
    %c0_i32_0 = arith.constant 0 : i32
    return %arg0, %c0_i32 : i32, i32
  }
}

</mosaic_0001>

<bundles_post_ra>
// kernel: tpu_custom_call.1
= control target key start
LH: loop header
LB: loop body
LE: loop exit
PB: predicated region body
PF: predicated region fallthrough
CT: control target
= control target key end

     0   :  { %vm374_vm0 = vcmask 130048   ;;  %v13_v30 = vlaneseq  ;;  %s1886_s1 = inlined_call_operand.vmem [shape: f32[128,16], index: 1, kind: input, shape index: {}]   ;;  %s1887_s0 = inlined_call_operand.<no memory space> [shape: s32[1], index: 0, kind: input, shape index: {}]   ;;  %s1888_s2 = inlined_call_operand.vmem [shape: f32[128,16], index: 2, kind: output, shape index: {}]  }
   0x1   :  { %v1170_v0 = vld [vmem:[%s1886_s1 + $0x20] sm:$0xff]  ;;  %v1175_v1 = vld [vmem:[%s1886_s1 + $0x10] sm:$0xff]  ;;  %v1191_v6 = vld [vmem:[%s1886_s1 + $0x28] sm:$0xff]  ;;  %s82_s13 = sxor.u32 2654435769, %s1887_s0 }
   0x2   :  { %v1180_v2 = vld [vmem:[%s1886_s1] sm:$0xff]  ;;  %v387_v3 = vsel %vm374_vm0, %v1170_v0, -inf  ;;  %v381_v4 = vsel %vm374_vm0, %v1175_v1, -inf  ;;  %v1196_v7 = vld [vmem:[%s1886_s1 + $0x18] sm:$0xff]  ;;  %v1201_v8 = vld [vmem:[%s1886_s1 + $0x8] sm:$0xff]  ;;  %v390_v9 = vsel %vm374_vm0, %v1191_v6, -inf }
   0x3   :  { %v375_v5 = vsel %vm374_vm0, %v1180_v2, -inf  ;;  %388 = vmax.xlane.f32.xlu2 %v387_v3  ;;  %382 = vmax.xlane.f32.xlu1 %v381_v4  ;;  %v384_v10 = vsel %vm374_vm0, %v1196_v7, -inf  ;;  %v378_v11 = vsel %vm374_vm0, %v1201_v8, -inf  ;;  %v1212_v12 = vld [vmem:[%s1886_s1 + $0x40] sm:$0xff]  ;;  %v1217_v13 = vld [vmem:[%s1886_s1 + $0x38] sm:$0xff]  ;;  %v1222_v14 = vld [vmem:[%s1886_s1 + $0x30] sm:$0xff] }
   0x4   :  { %376 = vmax.xlane.f32.xlu0 %v375_v5  ;;  %v399_v15 = vsel %vm374_vm0, %v1212_v12, -inf  ;;  %v396_v16 = vsel %vm374_vm0, %v1217_v13, -inf  ;;  %v393_v17 = vsel %vm374_vm0, %v1222_v14, -inf  ;;  %v1233_v18 = vld [vmem:[%s1886_s1 + $0x58] sm:$0xff]  ;;  %v368_v19 = vld [vmem:[%s1886_s1 + $0x50] sm:$0xff]  ;;  %v1241_v20 = vld [vmem:[%s1886_s1 + $0x48] sm:$0xff] }
   0x5   :  { %v408_v21 = vsel %vm374_vm0, %v1233_v18, -inf  ;;  %v405_v22 = vsel %vm374_vm0, %v368_v19, -inf  ;;  %v402_v23 = vsel %vm374_vm0, %v1241_v20, -inf  ;;  %v372_v24 = vld [vmem:[%s1886_s1 + $0x70] sm:$0xff]  ;;  %v371_v25 = vld [vmem:[%s1886_s1 + $0x68] sm:$0xff]  ;;  %v370_v26 = vld [vmem:[%s1886_s1 + $0x60] sm:$0xff] }
   0x6   :  { %v417_v27 = vsel %vm374_vm0, %v372_v24, -inf  ;;  %v414_v28 = vsel %vm374_vm0, %v371_v25, -inf  ;;  %v411_v29 = vsel %vm374_vm0, %v370_v26, -inf  ;;  %v1263_v31 = vshrl.u32 %v13_v30, 7  ;;  %v373_v32 = vld [vmem:[%s1886_s1 + $0x78] sm:$0xff] }
   0x7   :  { %s83_s16 = smul.u32 2246822507, %s82_s13  ;;  %v1269_v34 = vand.u32 127, %v13_v30  ;;  %v420_v37 = vsel %vm374_vm0, %v373_v32, -inf }
   0x8   :  { %v16_v33 = vadd.s32 16, %v1263_v31  ;;  %v49_v36 = vmul.u32 16, %v1263_v31  ;;  %v19_v45 = vadd.s32 40, %v1263_v31  ;;  %v15_v46 = vadd.s32 8, %v1263_v31 }
   0x9   :  { %s84_s0 = sadd.s32 1757159915, %s83_s16  ;;  %v17_v47 = vadd.s32 24, %v1263_v31  ;;  %v18_v48 = vadd.s32 32, %v1263_v31 }
   0xa   :  { %v51_v35 = vmul.u32 16, %v16_v33  ;;  %v65_v39 = vadd.s32 %v49_v36, %v1269_v34  ;;  %v1275_v42 = vstv %s84_s0  ;;  %v54_v51 = vmul.u32 16, %v19_v45 }
   0xb   :  { %391 = vmax.xlane.f32.xlu2 %v390_v9  ;;  %385 = vmax.xlane.f32.xlu1 %v384_v10  ;;  %v50_v52 = vmul.u32 16, %v15_v46  ;;  %v52_v53 = vmul.u32 16, %v17_v47  ;;  %v53_v54 = vmul.u32 16, %v18_v48 }
   0xc   :  { %379 = vmax.xlane.f32.xlu0 %v378_v11  ;;  %v67_v38 = vadd.s32 %v51_v35, %v1269_v34  ;;  %v85_v41 = vmul.u32 2654435769, %v65_v39  ;;  %v70_v57 = vadd.s32 %v54_v51, %v1269_v34 }
   0xd   :  { %v66_v58 = vadd.s32 %v50_v52, %v1269_v34  ;;  %v68_v59 = vadd.s32 %v52_v53, %v1269_v34  ;;  %v69_v60 = vadd.s32 %v53_v54, %v1269_v34 }
   0xe   :  { %v87_v40 = vmul.u32 2654435769, %v67_v38  ;;  %v102_v44 = vadd.s32 %v1275_v42, %v85_v41  ;;  %v90_v63 = vmul.u32 2654435769, %v70_v57 }
   0xf   :  { %v86_v3 = vmul.u32 2654435769, %v66_v58  ;;  %v88_v4 = vmul.u32 2654435769, %v68_v59  ;;  %v89_v5 = vmul.u32 2654435769, %v69_v60 }
  0x10   :  { %v104_v43 = vadd.s32 %v1275_v42, %v87_v40  ;;  %v118_v50 = vshrl.u32 %v102_v44, 16  ;;  %v107_v11 = vadd.s32 %v1275_v42, %v90_v63 }
  0x11   :  { %v106_v19 = vadd.s32 %v1275_v42, %v89_v5 }
  0x12   :  { %v120_v49 = vshrl.u32 %v104_v43, 16  ;;  %v134_v56 = vxor.u32 %v118_v50, %v102_v44  ;;  %v123_v24 = vshrl.u32 %v107_v11, 16 }
  0x13   :  { %400 = vmax.xlane.f32.xlu2 %v399_v15  ;;  %397 = vmax.xlane.f32.xlu1 %v396_v16  ;;  %v22_v15 = vadd.s32 64, %v1263_v31  ;;  %v103_v16 = vadd.s32 %v1275_v42, %v86_v3 }
  0x14   :  { %394 = vmax.xlane.f32.xlu0 %v393_v17  ;;  %v136_v55 = vxor.u32 %v120_v49, %v104_v43  ;;  %v150_v62 = vmul.u32 2246822507, %v134_v56  ;;  %v105_v17 = vadd.s32 %v1275_v42, %v88_v4  ;;  %v139_v33 = vxor.u32 %v123_v24, %v107_v11 }
  0x15   :  { %v57_v25 = vmul.u32 16, %v22_v15  ;;  %v119_v26 = vshrl.u32 %v103_v16, 16 }
  0x16   :  { %v152_v61 = vmul.u32 2246822507, %v136_v55  ;;  %v166_v10 = vshrl.u32 %v150_v62, 13  ;;  %v155_v43 = vmul.u32 2246822507, %v139_v33 }
  0x17   :  { %v73_v35 = vadd.s32 %v57_v25, %v1269_v34  ;;  %v135_v36 = vxor.u32 %v119_v26, %v103_v16 }
  0x18   :  { %v168_v9 = vshrl.u32 %v152_v61, 13  ;;  %v171_v50 = vshrl.u32 %v155_v43, 13 }
  0x19   :  { %v93_v44 = vmul.u32 2654435769, %v73_v35  ;;  %v151_v45 = vmul.u32 2246822507, %v135_v36 }
  0x1a   :  { %v187_v58 = vxor.u32 %v171_v50, %v155_v43  ;;  %v21_v50 = vadd.s32 56, %v1263_v31 }
  0x1b   :  { %409 = vmax.xlane.f32.xlu2 %v408_v21  ;;  %406 = vmax.xlane.f32.xlu1 %v405_v22  ;;  %v20_v21 = vadd.s32 48, %v1263_v31  ;;  %v184_v22 = vxor.u32 %v168_v9, %v152_v61  ;;  %v110_v51 = vadd.s32 %v1275_v42, %v93_v44  ;;  %v167_v52 = vshrl.u32 %v151_v45, 13 }
  0x1c   :  { %403 = vmax.xlane.f32.xlu0 %v402_v23  ;;  %v182_v23 = vxor.u32 %v166_v10, %v150_v62  ;;  %v203_v5 = vmul.u32 3266489909, %v187_v58  ;;  %v56_v58 = vmul.u32 16, %v21_v50 }
  0x1d   :  { %v200_v30 = vmul.u32 3266489909, %v184_v22  ;;  %v126_v59 = vshrl.u32 %v110_v51, 16  ;;  %v183_v60 = vxor.u32 %v167_v52, %v151_v45 }
  0x1e   :  { %v198_v32 = vmul.u32 3266489909, %v182_v23 }
  0x1f   :  { %v216_v40 = vshrl.u32 %v200_v30, 16  ;;  %v142_v9 = vxor.u32 %v126_v59, %v110_v51  ;;  %v199_v10 = vmul.u32 3266489909, %v183_v60 }
  0x20   :  { %v214_v41 = vshrl.u32 %v198_v32, 16 }
  0x21   :  { %v232_v48 = vxor.u32 %v216_v40, %v200_v30  ;;  %v215_v22 = vshrl.u32 %v199_v10, 16 }
  0x22   :  { %v230_v49 = vxor.u32 %v214_v41, %v198_v32 }
  0x23   :  { %418 = vmax.xlane.f32.xlu2 %v417_v27  ;;  %415 = vmax.xlane.f32.xlu1 %v414_v28  ;;  %v121_v27 = vshrl.u32 %v105_v17, 16  ;;  %v122_v28 = vshrl.u32 %v106_v19, 16  ;;  %v248_v56 = vshrl.u32 %v232_v48, 8  ;;  %v231_v30 = vxor.u32 %v215_v22, %v199_v10 }
  0x24   :  { %412 = vmax.xlane.f32.xlu0 %v411_v29  ;;  %v55_v29 = vmul.u32 16, %v20_v21  ;;  %v246_v57 = vshrl.u32 %v230_v49, 8  ;;  %v158_v21 = vmul.u32 2246822507, %v142_v9  ;;  %v72_v10 = vadd.s32 %v56_v58, %v1269_v34 }
  0x25   :  { %v138_v38 = vxor.u32 %v122_v28, %v106_v19  ;;  %v264_v3 = vcvt.s32.f32 %v248_v56  ;;  %v219_v19 = vshrl.u32 %v203_v5, 16 }
  0x26   :  { %v71_v39 = vadd.s32 %v55_v29, %v1269_v34  ;;  %v262_v4 = vcvt.s32.f32 %v246_v57  ;;  %v174_v29 = vshrl.u32 %v158_v21, 13 }
  0x27   :  { %v154_v47 = vmul.u32 2246822507, %v138_v38  ;;  %v280_v16 = vmul.f32 5.9604645e-08, %v264_v3  ;;  %v235_v28 = vxor.u32 %v219_v19, %v203_v5  ;;  %v25_v38 = vadd.s32 88, %v1263_v31 }
  0x28   :  { %v91_v55 = vmul.u32 2654435769, %v71_v39  ;;  %v247_v39 = vshrl.u32 %v231_v30, 8 }
  0x29   :  { %v170_v54 = vshrl.u32 %v154_v47, 13  ;;  %v296_v26 = vmax.f32 %v280_v16, 1e-10  ;;  %v251_v36 = vshrl.u32 %v235_v28, 8 }
  0x2a   :  { %v108_v63 = vadd.s32 %v1275_v42, %v91_v55 }
  0x2b   :  { %v186_v62 = vxor.u32 %v170_v54, %v154_v47  ;;  %1019 = vlog2.f32 %v296_v26  ;;  %v267_v43 = vcvt.s32.f32 %v251_v36  ;;  %v263_v47 = vcvt.s32.f32 %v247_v39 }
  0x2c   :  { %421 = vmax.xlane.f32.xlu0 %v420_v37  ;;  %v137_v37 = vxor.u32 %v121_v27, %v105_v17  ;;  %v278_v17 = vmul.f32 5.9604645e-08, %v262_v4  ;;  %v124_v25 = vshrl.u32 %v108_v63, 16 }
  0x2d   :  { %v202_v15 = vmul.u32 3266489909, %v186_v62  ;;  %v283_v51 = vmul.f32 5.9604645e-08, %v267_v43  ;;  %v279_v55 = vmul.f32 5.9604645e-08, %v263_v47 }
  0x2e   :  { %v153_v46 = vmul.u32 2246822507, %v137_v37  ;;  %v294_v27 = vmax.f32 %v278_v17, 1e-10  ;;  %v140_v35 = vxor.u32 %v124_v25, %v108_v63  ;;  %v190_v37 = vxor.u32 %v174_v29, %v158_v21 }
  0x2f   :  { %v218_v24 = vshrl.u32 %v202_v15, 16  ;;  %v299_v60 = vmax.f32 %v283_v51, 1e-10  ;;  %v295_v5 = vmax.f32 %v279_v55, 1e-10 }
  0x30   :  { %v169_v53 = vshrl.u32 %v153_v46, 13  ;;  %1021 = vlog2.f32 %v294_v27  ;;  %v206_v44 = vmul.u32 3266489909, %v190_v37  ;;  %v156_v45 = vmul.u32 2246822507, %v140_v35 }
  0x31   :  { %v234_v33 = vxor.u32 %v218_v24, %v202_v15  ;;  %v1020_v59 = vpop.eup %1019  ;;  %1023 = vlog2.f32 %v299_v60  ;;  %v92_v24 = vmul.u32 2654435769, %v72_v10 }
  0x32   :  { %v185_v61 = vxor.u32 %v169_v53, %v153_v46  ;;  %v60_v46 = vmul.u32 16, %v25_v38  ;;  %v222_v52 = vshrl.u32 %v206_v44, 16  ;;  %v172_v53 = vshrl.u32 %v156_v45, 13 }
  0x33   :  { %v250_v41 = vshrl.u32 %v234_v33, 8  ;;  %v315_v4 = vmul.f32 0.6931472, %v1020_v59  ;;  %1025 = vlog2.f32 %v295_v5  ;;  %v109_v28 = vadd.s32 %v1275_v42, %v92_v24 }
  0x34   :  { %v201_v11 = vmul.u32 3266489909, %v185_v61  ;;  %v76_v54 = vadd.s32 %v60_v46, %v1269_v34  ;;  %v238_v61 = vxor.u32 %v222_v52, %v206_v44  ;;  %v188_v62 = vxor.u32 %v172_v53, %v156_v45 }
  0x35   :  { %v266_v49 = vcvt.s32.f32 %v250_v41  ;;  %v1301_v17 = vsub.f32 0.0, %v315_v4  ;;  %v125_v36 = vshrl.u32 %v109_v28, 16 }
  0x36   :  { %v217_v23 = vshrl.u32 %v201_v11, 16  ;;  %v96_v63 = vmul.u32 2654435769, %v76_v54  ;;  %v1022_v3 = vpop.eup %1021  ;;  %v254_v15 = vshrl.u32 %v238_v61, 8  ;;  %v204_v19 = vmul.u32 3266489909, %v188_v62 }
  0x37   :  { %v282_v57 = vmul.f32 5.9604645e-08, %v266_v49  ;;  %v1024_v33 = vpop.eup %1023  ;;  %v1320_v53 = vxor.u32 %v125_v36, %v109_v28  ;;  %v512_v5 = vand.u32 2147483648, %v1301_v17  ;;  %vm506_vm1 = vweird.f32 %v1301_v17 }
  0x38   :  { %v233_v32 = vxor.u32 %v217_v23, %v201_v11  ;;  %v311_v11 = vmul.f32 0.6931472, %v1022_v3  ;;  %v113_v21 = vadd.s32 %v1275_v42, %v96_v63  ;;  %v270_v23 = vcvt.s32.f32 %v254_v15 }
  0x39   :  { %v298_v16 = vmax.f32 %v282_v57, 1e-10  ;;  %v220_v25 = vshrl.u32 %v204_v19, 16  ;;  %v1026_v37 = vpop.eup %1025  ;;  %v321_v38 = vmul.f32 0.6931472, %v1024_v33 }
  0x3a   :  { %v249_v40 = vshrl.u32 %v233_v32, 8  ;;  %v1304_v22 = vsub.f32 0.0, %v311_v11  ;;  %v129_v26 = vshrl.u32 %v113_v21, 16  ;;  %v286_v27 = vmul.f32 5.9604645e-08, %v270_v23 }
  0x3b   :  { %v236_v29 = vxor.u32 %v220_v25, %v204_v19  ;;  %v23_v32 = vadd.s32 72, %v1263_v31  ;;  %v313_v43 = vmul.f32 0.6931472, %v1026_v37  ;;  %v1312_v45 = vsub.f32 0.0, %v321_v38 }
  0x3c   :  { %v265_v48 = vcvt.s32.f32 %v249_v40  ;;  %v145_v30 = vxor.u32 %v129_v26, %v113_v21  ;;  %v302_v35 = vmax.f32 %v286_v27, 1e-10  ;;  %v157_v4 = vmul.u32 2246822507, %v1320_v53 }
  0x3d   :  { %v252_v39 = vshrl.u32 %v236_v29, 8  ;;  %v1318_v51 = vsub.f32 0.0, %v313_v43  ;;  %v482_v24 = vand.u32 2147483648, %v1304_v22  ;;  %v510_v29 = vand.u32 2147483647, %v1301_v17 }
  0x3e   :  { %v281_v56 = vmul.f32 5.9604645e-08, %v265_v48  ;;  %v161_v40 = vmul.u32 2246822507, %v145_v30  ;;  %v58_v48 = vmul.u32 16, %v23_v32  ;;  %v173_v26 = vshrl.u32 %v157_v4, 13 }
  0x3f   :  { %v268_v47 = vcvt.s32.f32 %v252_v39  ;;  %v513_v30 = vor.u32 1.1754944e-38, %v512_v5  ;;  %vm476_vm4 = vweird.f32 %v1304_v22  ;;  %vm551_vm7 = vweird.f32 %v1312_v45 }
  0x40   :  { %v297_v9 = vmax.f32 %v281_v56, 1e-10  ;;  %v177_v52 = vshrl.u32 %v161_v40, 13  ;;  %v1330_v61 = vadd.s32 %v58_v48, %v1269_v34  ;;  %v497_v48 = vand.u32 2147483648, %v1318_v51 }
  0x41   :  { %v284_v60 = vmul.f32 5.9604645e-08, %v268_v47  ;;  %vm491_vm9 = vweird.f32 %v1318_v51  ;;  %vm1391_vm10 = vcmp.eq.f32.partialorder %v510_v29, 8.507059e+37 }
  0x42   :  { %1027 = vlog2.f32 %v297_v9  ;;  %v1333_v3 = vxor.u32 %v177_v52, %v161_v40  ;;  %v94_v19 = vmul.u32 2654435769, %v1330_v61  ;;  %v480_v40 = vand.u32 2147483647, %v1304_v22 }
  0x43   :  { %1029 = vrcp.f32 %v1301_v17 }
  0x44   :  { %1031 = vrcp.f32 %v1304_v22  ;;  %v209_v25 = vmul.u32 3266489909, %v1333_v3  ;;  %vm1409_vm13 = vcmp.eq.f32.partialorder %v480_v40, 8.507059e+37 }
  0x45   :  { %1033 = vlog2.f32 %v298_v16  ;;  %v300_v16 = vmax.f32 %v284_v60, 1e-10 }
  0x46   :  { %1035 = vlog2.f32 %v302_v35 }
  0x47   :  { %1037 = vrcp.f32 %v1312_v45 }
  0x48   :  { %v1028_v41 = vpop.eup %1027  ;;  %1039 = vrcp.f32 %v1318_v51 }
  0x49   :  { %v1310_v44 = vpop.eup %1029  ;;  %v317_v46 = vmul.f32 0.6931472, %v1028_v41 }
  0x4a   :  { %v1314_v49 = vpop.eup %1031  ;;  %v502_v50 = vmul.f32 %v1310_v44, %v1301_v17  ;;  %vm507_vm2 = vweird.f32 %v1310_v44 }
  0x4b   :  { %v1034_v54 = vpop.eup %1033  ;;  %v472_v55 = vmul.f32 %v1314_v49, %v1304_v22  ;;  %v1325_v56 = vsub.f32 0.0, %v317_v46  ;;  %vm1356_vm3 = vmor %vm506_vm1, %vm507_vm2  ;;  %vm477_vm5 = vweird.f32 %v1314_v49  ;;  %v557_v46 = vand.u32 2147483648, %v1312_v45 }
  0x4c   :  { %v503_v57 = vsub.f32 1.0, %v502_v50  ;;  %v319_v58 = vmul.f32 0.6931472, %v1034_v54  ;;  %v1036_v62 = vpop.eup %1035  ;;  %vm1383_vm6 = vmor %vm476_vm4, %vm477_vm5  ;;  %v555_v22 = vand.u32 2147483647, %v1312_v45 }
  0x4d   :  { %v473_v59 = vsub.f32 1.0, %v472_v55  ;;  %1041 = vrcp.f32 %v1325_v56  ;;  %v327_v11 = vmul.f32 0.6931472, %v1036_v62  ;;  %v1342_v15 = vpop.eup %1037  ;;  %vm521_vm15 = vweird.f32 %v1325_v56 }
  0x4e   :  { %v504_v63 = vmul.f32 %v1310_v44, %v503_v57  ;;  %v1337_v9 = vsub.f32 0.0, %v319_v58  ;;  %v1345_v21 = vpop.eup %1039  ;;  %v547_v32 = vmul.f32 %v1342_v15, %v1312_v45  ;;  %vm552_vm8 = vweird.f32 %v1342_v15 }
  0x4f   :  { %v474_v10 = vmul.f32 %v1314_v49, %v473_v59  ;;  %v487_v33 = vmul.f32 %v1345_v21, %v1318_v51  ;;  %v1368_v37 = vsub.f32 0.0, %v327_v11  ;;  %vm1396_vm11 = vmor %vm551_vm7, %vm552_vm8  ;;  %vm492_vm12 = vweird.f32 %v1345_v21 }
  0x50   :  { %v1348_v23 = vadd.f32 %v1310_v44, %v504_v63  ;;  %1043 = vrcp.f32 %v1337_v9  ;;  %v548_v17 = vsub.f32 1.0, %v547_v32  ;;  %v483_v57 = vor.u32 1.1754944e-38, %v482_v24  ;;  %vm1413_vm14 = vmor %vm491_vm9, %vm492_vm12 }
  0x51   :  { %v475_v35 = vadd.f32 %v1314_v49, %v474_v10  ;;  %v488_v38 = vsub.f32 1.0, %v487_v33  ;;  %1045 = vrcp.f32 %v1368_v37  ;;  %v495_v58 = vand.u32 2147483647, %v1318_v51 }
  0x52   :  { %v509_v39 = vsel %vm1356_vm3, %v1310_v44, %v1348_v23  ;;  %v549_v43 = vmul.f32 %v1342_v15, %v548_v17  ;;  %1047 = vlog2.f32 %v300_v16  ;;  %vm1424_vm2 = vcmp.eq.f32.partialorder %v555_v22, 8.507059e+37 }
  0x53   :  { %v1354_v27 = vpop.eup %1041  ;;  %v489_v47 = vmul.f32 %v1345_v21, %v488_v38  ;;  %v479_v60 = vsel %vm1383_vm6, %v1314_v49, %v475_v35  ;;  %v558_v10 = vor.u32 1.1754944e-38, %v557_v46  ;;  %v498_v11 = vor.u32 1.1754944e-38, %v497_v48 }
  0x54   :  { %v517_v36 = vmul.f32 %v1354_v27, %v1325_v56  ;;  %v550_v52 = vadd.f32 %v1342_v15, %v549_v43  ;;  %vm522_vm1 = vweird.f32 %v1354_v27  ;;  %v525_v23 = vand.u32 2147483647, %v1325_v56 }
  0x55   :  { %v490_v45 = vadd.f32 %v1345_v21, %v489_v47  ;;  %vm496_vm3 = vcmp.eq.f32.partialorder %v495_v58, 8.507059e+37  ;;  %vm1437_vm4 = vmor %vm521_vm15, %vm522_vm1  ;;  %v527_v32 = vand.u32 2147483648, %v1325_v56  ;;  %v189_v17 = vxor.u32 %v173_v26, %v157_v4 }
  0x56   :  { %v518_v41 = vsub.f32 1.0, %v517_v36  ;;  %v1401_v55 = vpop.eup %1043  ;;  %v554_v51 = vsel %vm1396_vm11, %v1342_v15, %v550_v52  ;;  %v225_v36 = vshrl.u32 %v209_v25, 16  ;;  %v28_v38 = vadd.s32 112, %v1263_v31 }
  0x57   :  { %v1419_v5 = vpop.eup %1045  ;;  %v532_v28 = vmul.f32 %v1401_v55, %v1337_v9  ;;  %v494_v15 = vsel %vm1413_vm14, %v1345_v21, %v490_v45  ;;  %v1449_v21 = vsel %vm1391_vm10, %v513_v30, %v509_v39  ;;  %v1453_v40 = vsel %vm1409_vm13, %v483_v57, %v479_v60 }
  0x58   :  { %v519_v59 = vmul.f32 %v1354_v27, %v518_v41  ;;  %v592_v24 = vmul.f32 %v1419_v5, %v1368_v37  ;;  %v1048_v33 = vpop.eup %1047  ;;  %v1457_v56 = vsel %vm1424_vm2, %v558_v10, %v554_v51  ;;  %v111_v41 = vadd.s32 %v1275_v42, %v94_v19 }
  0x59   :  { %v533_v35 = vsub.f32 1.0, %v532_v28  ;;  %v1462_v53 = vsel %vm496_vm3, %v498_v11, %v494_v15  ;;  %vm1467_vm5 = vcmp.eq.f32.partialorder %v525_v23, 8.507059e+37  ;;  %v528_v39 = vor.u32 1.1754944e-38, %v527_v32 }
  0x5a   :  { %v520_v16 = vadd.f32 %v1354_v27, %v519_v59  ;;  %v593_v30 = vsub.f32 1.0, %v592_v24  ;;  %vm536_vm6 = vweird.f32 %v1337_v9  ;;  %vm537_vm7 = vweird.f32 %v1401_v55 }
  0x5b   :  { %v323_v43 = vmul.f32 0.6931472, %v1048_v33  ;;  %v602_v61 = vand.u32 2147483648, %v1368_v37  ;;  %v534_v19 = vmul.f32 %v1401_v55, %v533_v35  ;;  %v241_v46 = vxor.u32 %v225_v36, %v209_v25  ;;  %vm1498_vm10 = vmor %vm536_vm6, %vm537_vm7 }
  0x5c   :  { %v524_v4 = vsel %vm1437_vm4, %v1354_v27, %v520_v16  ;;  %v205_v47 = vmul.u32 3266489909, %v189_v17  ;;  %vm596_vm8 = vweird.f32 %v1368_v37  ;;  %vm597_vm9 = vweird.f32 %v1419_v5 }
  0x5d   :  { %v1479_v27 = vsub.f32 0.0, %v323_v43  ;;  %v127_v48 = vshrl.u32 %v111_v41, 16  ;;  %v594_v50 = vmul.f32 %v1419_v5, %v593_v30  ;;  %v542_v22 = vand.u32 2147483648, %v1337_v9  ;;  %vm1511_vm11 = vmor %vm596_vm8, %vm597_vm9 }
  0x5e   :  { %v257_v44 = vshrl.u32 %v241_v46, 8  ;;  %v221_v52 = vshrl.u32 %v205_v47, 16  ;;  %v1485_v3 = vsel %vm1467_vm5, %v528_v39, %v524_v4  ;;  %v600_v25 = vand.u32 2147483647, %v1368_v37 }
  0x5f   :  { %v540_v45 = vand.u32 2147483647, %v1337_v9  ;;  %1049 = vrcp.f32 %v1479_v27  ;;  %v535_v62 = vadd.f32 %v1401_v55, %v534_v19  ;;  %v63_v63 = vmul.u32 16, %v28_v38 }
  0x60   :  { %v273_v10 = vcvt.s32.f32 %v257_v44  ;;  %v237_v11 = vxor.u32 %v221_v52, %v205_v47  ;;  %v143_v16 = vxor.u32 %v127_v48, %v111_v41  ;;  %v1505_v23 = vor.u32 1.1754944e-38, %v602_v61 }
  0x61   :  { %v543_v24 = vor.u32 1.1754944e-38, %v542_v22  ;;  %v539_v33 = vsel %vm1498_vm10, %v1401_v55, %v535_v62  ;;  %vm541_vm12 = vcmp.eq.f32.partialorder %v540_v45, 8.507059e+37  ;;  %v79_v35 = vadd.s32 %v63_v63, %v1269_v34 }
  0x62   :  { %v289_v9 = vmul.f32 5.9604645e-08, %v273_v10  ;;  %v253_v15 = vshrl.u32 %v237_v11, 8  ;;  %v159_v29 = vmul.u32 2246822507, %v143_v16  ;;  %v24_v52 = vadd.s32 80, %v1263_v31 }
  0x63   :  { %v99_v26 = vmul.u32 2654435769, %v79_v35  ;;  %v544_v39 = vsel %vm541_vm12, %v543_v24, %v539_v33  ;;  %v570_v62 = vand.u32 2147483647, %v1479_v27  ;;  %vm1536_vm13 = vcmp.eq.f32.partialorder %v600_v25, 8.507059e+37 }
  0x64   :  { %v305_v17 = vmax.f32 %v289_v9, 1e-10  ;;  %v269_v37 = vcvt.s32.f32 %v253_v15  ;;  %v175_v38 = vshrl.u32 %v159_v29, 13  ;;  %vm566_vm14 = vweird.f32 %v1479_v27 }
  0x65   :  { %v1519_v36 = vpop.eup %1049  ;;  %v116_v48 = vadd.s32 %v1275_v42, %v99_v26  ;;  %vm1555_vm1 = vcmp.eq.f32.partialorder %v570_v62, 8.507059e+37 }
  0x66   :  { %v562_v4 = vmul.f32 %v1519_v36, %v1479_v27  ;;  %v285_v43 = vmul.f32 5.9604645e-08, %v269_v37  ;;  %v191_v61 = vxor.u32 %v175_v38, %v159_v29  ;;  %vm567_vm15 = vweird.f32 %v1519_v36 }
  0x67   :  { %vm1575_vm2 = vmor %vm566_vm14, %vm567_vm15 }
  0x68   :  { %v301_v22 = vmax.f32 %v285_v43, 1e-10  ;;  %v207_v44 = vmul.u32 3266489909, %v191_v61  ;;  %v563_v45 = vsub.f32 1.0, %v562_v4 }
  0x6a   :  { %v564_v25 = vmul.f32 %v1519_v36, %v563_v45 }
  0x76   :  { %v389_v54 = vpop.xlane.xlu2 %388  ;;  %v383_v57 = vpop.xlane.xlu1 %382 }
  0x77   :  { %v427_v58 = vsub.f32 %v1170_v0, %v389_v54  ;;  %v425_v59 = vsub.f32 %v1175_v1, %v383_v57  ;;  %v377_v60 = vpop.xlane.xlu0 %376  ;;  %v1503_v1 = vadd.f32 %v1419_v5, %v594_v50 }
  0x78   :  { %v423_v51 = vsub.f32 %v1180_v2, %v377_v60 }
  0x79   :  { %v443_v0 = vmul.f32 1.442695, %v425_v59  ;;  %v447_v32 = vmul.f32 1.442695, %v427_v58  ;;  %v599_v41 = vsel %vm1511_vm11, %v1419_v5, %v1503_v1  ;;  %v132_v58 = vshrl.u32 %v116_v48, 16 }
  0x7a   :  { %v439_v28 = vmul.f32 1.442695, %v423_v51  ;;  %v572_v51 = vand.u32 2147483648, %v1479_v27 }
  0x7b   :  { %1051 = vpow2.f32 %v443_v0  ;;  %v1541_v49 = vxor.u32 %v132_v58, %v116_v48  ;;  %v59_v0 = vmul.u32 16, %v24_v52 }
  0x7c   :  { %1053 = vpow2.f32 %v439_v28  ;;  %v573_v26 = vor.u32 1.1754944e-38, %v572_v51 }
  0x7d   :  { %1055 = vlog2.f32 %v305_v17 }
  0x7e   :  { %v392_v55 = vpop.xlane.xlu2 %391  ;;  %v386_v30 = vpop.xlane.xlu1 %385  ;;  %1057 = vpow2.f32 %v447_v32 }
  0x7f   :  { %v428_v19 = vsub.f32 %v1191_v6, %v392_v55  ;;  %v426_v46 = vsub.f32 %v1196_v7, %v386_v30  ;;  %v380_v47 = vpop.xlane.xlu0 %379  ;;  %1059 = vlog2.f32 %v301_v22  ;;  %v223_v6 = vshrl.u32 %v207_v44, 16 }
  0x80   :  { %v424_v50 = vsub.f32 %v1201_v8, %v380_v47  ;;  %v75_v30 = vadd.s32 %v59_v0, %v1269_v34 }
  0x81   :  { %v449_v54 = vmul.f32 1.442695, %v428_v19  ;;  %v445_v57 = vmul.f32 1.442695, %v426_v46  ;;  %v1052_v59 = vpop.eup %1051  ;;  %v239_v16 = vxor.u32 %v223_v6, %v207_v44  ;;  %v565_v19 = vadd.f32 %v1519_v36, %v564_v25 }
  0x82   :  { %v441_v60 = vmul.f32 1.442695, %v424_v50  ;;  %v1054_v7 = vpop.eup %1053  ;;  %v1534_v63 = vmul.f32 %v1052_v59, %v1449_v21  ;;  %v95_v27 = vmul.u32 2654435769, %v75_v30 }
  0x83   :  { %1061 = vpow2.f32 %v449_v54  ;;  %v1056_v10 = vpop.eup %1055  ;;  %v1544_v11 = vmul.f32 %v1054_v7, %v1453_v40  ;;  %v255_v29 = vshrl.u32 %v239_v16, 8  ;;  %v164_v40 = vmul.u32 2246822507, %v1541_v49 }
  0x84   :  { %1063 = vpow2.f32 %v445_v57  ;;  %v1058_v24 = vpop.eup %1057  ;;  %v717_v21 = vsel %vm374_vm0, %v1534_v63, 0.0  ;;  %v333_v28 = vmul.f32 0.6931472, %v1056_v10  ;;  %v569_v45 = vsel %vm1575_vm2, %v1519_v36, %v565_v19 }
  0x85   :  { %1065 = vpow2.f32 %v441_v60  ;;  %718 = vadd.xlane.f32.xlu0 %v717_v21  ;;  %v711_v9 = vsel %vm374_vm0, %v1544_v11, 0.0  ;;  %v1060_v38 = vpop.eup %1059  ;;  %v271_v55 = vcvt.s32.f32 %v255_v29  ;;  %v574_v5 = vsel %vm1555_vm1, %v573_v26, %v569_v45 }
  0x86   :  { %v401_v15 = vpop.xlane.xlu2 %400  ;;  %712 = vadd.xlane.f32.xlu1 %v711_v9  ;;  %v398_v35 = vpop.xlane.xlu1 %397  ;;  %v1559_v37 = vsub.f32 0.0, %v333_v28  ;;  %v325_v52 = vmul.f32 0.6931472, %v1060_v38 }
  0x87   :  { %v431_v32 = vsub.f32 %v1212_v12, %v401_v15  ;;  %v395_v33 = vpop.xlane.xlu0 %394  ;;  %v1563_v12 = vmul.f32 %v1058_v24, %v544_v39  ;;  %v430_v50 = vsub.f32 %v1217_v13, %v398_v35  ;;  %v180_v39 = vshrl.u32 %v164_v40, 13 }
  0x88   :  { %v429_v4 = vsub.f32 %v1222_v14, %v395_v33  ;;  %1067 = vrcp.f32 %v1559_v37  ;;  %v287_v54 = vmul.f32 5.9604645e-08, %v271_v55  ;;  %v1592_v58 = vsub.f32 0.0, %v325_v52 }
  0x89   :  { %v1062_v43 = vpop.eup %1061  ;;  %v455_v61 = vmul.f32 1.442695, %v431_v32  ;;  %v723_v36 = vsel %vm374_vm0, %v1563_v12, 0.0  ;;  %v645_v51 = vand.u32 2147483647, %v1559_v37  ;;  %v196_v2 = vxor.u32 %v180_v39, %v164_v40 }
  0x8a   :  { %v1064_v46 = vpop.eup %1063  ;;  %v451_v47 = vmul.f32 1.442695, %v429_v4  ;;  %v1568_v48 = vmul.f32 %v1062_v43, %v1457_v56  ;;  %v303_v62 = vmax.f32 %v287_v54, 1e-10  ;;  %v453_v49 = vmul.f32 1.442695, %v430_v50 }
  0x8b   :  { %v1066_v22 = vpop.eup %1065  ;;  %1069 = vpow2.f32 %v455_v61  ;;  %v1580_v44 = vmul.f32 %v1064_v46, %v1485_v3  ;;  %v26_v3 = vadd.s32 96, %v1263_v31  ;;  %v647_v10 = vand.u32 2147483648, %v1559_v37 }
  0x8c   :  { %1071 = vpow2.f32 %v451_v47  ;;  %v726_v13 = vsel %vm374_vm0, %v1568_v48, 0.0  ;;  %v1585_v56 = vmul.f32 %v1066_v22, %v1462_v53  ;;  %v604_v53 = vsel %vm1536_vm13, %v1505_v23, %v599_v41 }
  0x8d   :  { %v720_v57 = vsel %vm374_vm0, %v1580_v44, 0.0  ;;  %727 = vadd.xlane.f32.xlu0 %v726_v13  ;;  %1073 = vrcp.f32 %v1592_v58  ;;  %v112_v23 = vadd.s32 %v1275_v42, %v95_v27  ;;  %v61_v16 = vmul.u32 16, %v26_v3 }
  0x8e   :  { %v714_v59 = vsel %vm374_vm0, %v1585_v56, 0.0  ;;  %v410_v60 = vpop.xlane.xlu2 %409  ;;  %v1068_v6 = vpop.eup %1067  ;;  %721 = vadd.xlane.f32.xlu1 %v720_v57  ;;  %1075 = vlog2.f32 %v303_v62  ;;  %vm641_vm3 = vweird.f32 %v1559_v37  ;;  %vm1620_vm5 = vcmp.eq.f32.partialorder %v645_v51, 8.507059e+37 }
  0x8f   :  { %715 = vadd.xlane.f32.xlu2 %v714_v59  ;;  %v434_v7 = vsub.f32 %v1233_v18, %v410_v60  ;;  %v637_v1 = vmul.f32 %v1068_v6, %v1559_v37  ;;  %vm642_vm4 = vweird.f32 %v1068_v6  ;;  %v212_v28 = vmul.u32 3266489909, %v196_v2  ;;  %v404_v39 = vpop.xlane.xlu0 %403 }
  0x90   :  { %v128_v29 = vshrl.u32 %v112_v23, 16  ;;  %vm1628_vm6 = vmor %vm641_vm3, %vm642_vm4  ;;  %v648_v35 = vor.u32 1.1754944e-38, %v647_v10  ;;  %v77_v37 = vadd.s32 %v61_v16, %v1269_v34  ;;  %vm581_vm7 = vweird.f32 %v1592_v58 }
  0x91   :  { %v1070_v41 = vpop.eup %1069  ;;  %v461_v8 = vmul.f32 1.442695, %v434_v7  ;;  %v638_v24 = vsub.f32 1.0, %v637_v1  ;;  %v228_v17 = vshrl.u32 %v212_v28, 16  ;;  %v585_v26 = vand.u32 2147483647, %v1592_v58 }
  0x92   :  { %v1072_v18 = vpop.eup %1071  ;;  %v1615_v0 = vmul.f32 %v1070_v41, %v604_v53  ;;  %v587_v30 = vand.u32 2147483648, %v1592_v58  ;;  %v144_v61 = vxor.u32 %v128_v29, %v112_v23  ;;  %v97_v19 = vmul.u32 2654435769, %v77_v37 }
  0x93   :  { %1077 = vpow2.f32 %v461_v8  ;;  %v1618_v21 = vmul.f32 %v1072_v18, %v574_v5  ;;  %v639_v15 = vmul.f32 %v1068_v6, %v638_v24  ;;  %v1074_v40 = vpop.eup %1073  ;;  %v244_v43 = vxor.u32 %v228_v17, %v212_v28 }
  0x94   :  { %1079 = vpow2.f32 %v453_v49  ;;  %v735_v9 = vsel %vm374_vm0, %v1615_v0, 0.0  ;;  %v577_v4 = vmul.f32 %v1074_v40, %v1592_v58  ;;  %v1076_v55 = vpop.eup %1075  ;;  %vm582_vm8 = vweird.f32 %v1074_v40 }
  0x95   :  { %v729_v32 = vsel %vm374_vm0, %v1618_v21, 0.0  ;;  %736 = vadd.xlane.f32.xlu0 %v735_v9  ;;  %v640_v38 = vadd.f32 %v1068_v6, %v639_v15  ;;  %v329_v50 = vmul.f32 0.6931472, %v1076_v55  ;;  %v260_v52 = vshrl.u32 %v244_v43, 8  ;;  %vm1645_vm9 = vmor %vm581_vm7, %vm582_vm8 }
  0x96   :  { %730 = vadd.xlane.f32.xlu1 %v729_v32  ;;  %v578_v47 = vsub.f32 1.0, %v577_v4  ;;  %v588_v3 = vor.u32 1.1754944e-38, %v587_v30  ;;  %v160_v60 = vmul.u32 2246822507, %v144_v61  ;;  %v114_v53 = vadd.s32 %v1275_v42, %v97_v19  ;;  %v419_v30 = vpop.xlane.xlu2 %418 }
  0x97   :  { %724 = vadd.xlane.f32.xlu2 %v723_v36  ;;  %v644_v46 = vsel %vm1628_vm6, %v1068_v6, %v640_v38  ;;  %v351_v57 = vsub.f32 0.0, %v329_v50  ;;  %v276_v59 = vcvt.s32.f32 %v260_v52  ;;  %v432_v36 = vsub.f32 %v1241_v20, %v404_v39 }
  0x98   :  { %v649_v22 = vsel %vm1620_vm5, %v648_v35, %v644_v46  ;;  %v579_v27 = vmul.f32 %v1074_v40, %v578_v47  ;;  %vm586_vm10 = vcmp.eq.f32.partialorder %v585_v26, 8.507059e+37  ;;  %v176_v51 = vshrl.u32 %v160_v60, 13 }
  0x99   :  { %v1078_v14 = vpop.eup %1077  ;;  %1081 = vrcp.f32 %v351_v57  ;;  %v292_v7 = vmul.f32 5.9604645e-08, %v276_v59  ;;  %v130_v2 = vshrl.u32 %v114_v53, 16  ;;  %v457_v1 = vmul.f32 1.442695, %v432_v36 }
  0x9a   :  { %v1080_v54 = vpop.eup %1079  ;;  %v1641_v13 = vmul.f32 %v1078_v14, %v649_v22  ;;  %v580_v6 = vadd.f32 %v1074_v40, %v579_v27  ;;  %v192_v41 = vxor.u32 %v176_v51, %v160_v60  ;;  %v27_v8 = vadd.s32 104, %v1263_v31  ;;  %v1147_v27 = vld [vmem:[%s1886_s1 + $0x70] sm:$0xff] }
  0x9b   :  { %v308_v5 = vmax.f32 %v292_v7, 1e-10  ;;  %v146_v20 = vxor.u32 %v130_v2, %v114_v53  ;;  %v29_v10 = vadd.s32 120, %v1263_v31  ;;  %vm611_vm11 = vweird.f32 %v351_v57 }
  0x9c   :  { %v744_v62 = vsel %vm374_vm0, %v1641_v13, 0.0  ;;  %v584_v58 = vsel %vm1645_vm9, %v1074_v40, %v580_v6  ;;  %v208_v18 = vmul.u32 3266489909, %v192_v41  ;;  %v62_v28 = vmul.u32 16, %v27_v8 }
  0x9d   :  { %745 = vadd.xlane.f32.xlu0 %v744_v62  ;;  %v589_v49 = vsel %vm586_vm10, %v588_v3, %v584_v58  ;;  %1083 = vlog2.f32 %v308_v5  ;;  %v162_v25 = vmul.u32 2246822507, %v146_v20  ;;  %v64_v9 = vmul.u32 16, %v29_v10 }
  0x9e   :  { %v1655_v23 = vmul.f32 %v1080_v54, %v589_v49  ;;  %1085 = vpow2.f32 %v457_v1  ;;  %v224_v29 = vshrl.u32 %v208_v18, 16  ;;  %v617_v40 = vand.u32 2147483648, %v351_v57 }
  0x9f   :  { %v1082_v24 = vpop.eup %1081  ;;  %v178_v32 = vshrl.u32 %v162_v25, 13  ;;  %v78_v33 = vadd.s32 %v62_v28, %v1269_v34  ;;  %v80_v35 = vadd.s32 %v64_v9, %v1269_v34  ;;  %v615_v17 = vand.u32 2147483647, %v351_v57 }
  0xa0   :  { %v732_v16 = vsel %vm374_vm0, %v1655_v23, 0.0  ;;  %v607_v15 = vmul.f32 %v1082_v24, %v351_v57  ;;  %vm612_vm12 = vweird.f32 %v1082_v24  ;;  %v240_v37 = vxor.u32 %v224_v29, %v208_v18 }
  0xa1   :  { %733 = vadd.xlane.f32.xlu2 %v732_v16  ;;  %v194_v4 = vxor.u32 %v178_v32, %v162_v25  ;;  %v98_v26 = vmul.u32 2654435769, %v78_v33  ;;  %v100_v55 = vmul.u32 2654435769, %v80_v35  ;;  %vm1664_vm13 = vmor %vm611_vm11, %vm612_vm12  ;;  %v618_v47 = vor.u32 1.1754944e-38, %v617_v40 }
  0xa2   :  { %v608_v31 = vsub.f32 1.0, %v607_v15  ;;  %v256_v19 = vshrl.u32 %v240_v37, 8  ;;  %vm616_vm14 = vcmp.eq.f32.partialorder %v615_v17, 8.507059e+37  ;;  %v437_v57 = vsub.f32 %v1147_v27, %v419_v30  ;;  %v413_v27 = vpop.xlane.xlu0 %412 }
  0xa3   :  { %v1084_v38 = vpop.eup %1083  ;;  %v210_v50 = vmul.u32 3266489909, %v194_v4  ;;  %v115_v34 = vadd.s32 %v1275_v42, %v98_v26  ;;  %v117_v14 = vadd.s32 %v1275_v42, %v100_v55  ;;  %v407_v55 = vpop.xlane.xlu1 %406 }
  0xa4   :  { %v609_v43 = vmul.f32 %v1082_v24, %v608_v31  ;;  %v339_v61 = vmul.f32 0.6931472, %v1084_v38  ;;  %v1086_v39 = vpop.eup %1085  ;;  %v272_v54 = vcvt.s32.f32 %v256_v19  ;;  %v467_v58 = vmul.f32 1.442695, %v437_v57 }
  0xa5   :  { %v226_v45 = vshrl.u32 %v210_v50, 16  ;;  %v131_v3 = vshrl.u32 %v115_v34, 16  ;;  %v133_v59 = vshrl.u32 %v117_v14, 16 }
  0xa6   :  { %v610_v22 = vadd.f32 %v1082_v24, %v609_v43  ;;  %v356_v52 = vsub.f32 0.0, %v339_v61  ;;  %v288_v36 = vmul.f32 5.9604645e-08, %v272_v54 }
  0xa7   :  { %v242_v42 = vxor.u32 %v226_v45, %v210_v50  ;;  %v147_v6 = vxor.u32 %v131_v3, %v115_v34  ;;  %v149_v7 = vxor.u32 %v133_v59, %v117_v14 }
  0xa8   :  { %v614_v60 = vsel %vm1664_vm13, %v1082_v24, %v610_v22  ;;  %1087 = vrcp.f32 %v356_v52  ;;  %v304_v51 = vmax.f32 %v288_v36, 1e-10  ;;  %vm686_vm15 = vweird.f32 %v356_v52 }
  0xa9   :  { %v619_v53 = vsel %vm616_vm14, %v618_v47, %v614_v60  ;;  %v258_v2 = vshrl.u32 %v242_v42, 8  ;;  %v163_v5 = vmul.u32 2246822507, %v147_v6  ;;  %v165_v1 = vmul.u32 2246822507, %v149_v7  ;;  %v1148_v47 = vld [vmem:[%s1886_s1 + $0x50] sm:$0xff] }
  0xaa   :  { %v1675_v62 = vmul.f32 %v1086_v39, %v619_v53  ;;  %1089 = vlog2.f32 %v304_v51  ;;  %v692_v24 = vand.u32 2147483648, %v356_v52  ;;  %v690_v15 = vand.u32 2147483647, %v356_v52  ;;  %v1149_v6 = vld [vmem:[%s1886_s1 + $0x60] sm:$0xff] }
  0xab   :  { %v274_v41 = vcvt.s32.f32 %v258_v2  ;;  %v179_v8 = vshrl.u32 %v163_v5, 13  ;;  %v181_v10 = vshrl.u32 %v165_v1, 13  ;;  %1091 = vpow2.f32 %v467_v58 }
  0xac   :  { %v738_v49 = vsel %vm374_vm0, %v1675_v62, 0.0  ;;  %v693_v17 = vor.u32 1.1754944e-38, %v692_v24  ;;  %vm691_vm3 = vcmp.eq.f32.partialorder %v690_v15, 8.507059e+37  ;;  %v433_v50 = vsub.f32 %v1148_v47, %v407_v55  ;;  %v416_v15 = vpop.xlane.xlu1 %415 }
  0xad   :  { %739 = vadd.xlane.f32.xlu1 %v738_v49  ;;  %v290_v18 = vmul.f32 5.9604645e-08, %v274_v41  ;;  %v195_v25 = vxor.u32 %v179_v8, %v163_v5  ;;  %v197_v28 = vxor.u32 %v181_v10, %v165_v1  ;;  %v435_v7 = vsub.f32 %v1149_v6, %v413_v27 }
  0xae   :  { %v1088_v20 = vpop.eup %1087  ;;  %v459_v59 = vmul.f32 1.442695, %v433_v50  ;;  %v1151_v50 = vld [vmem:[%s1886_s1 + $0x78] sm:$0xff] }
  0xaf   :  { %v682_v16 = vmul.f32 %v1088_v20, %v356_v52  ;;  %vm687_vm1 = vweird.f32 %v1088_v20  ;;  %v306_v29 = vmax.f32 %v290_v18, 1e-10  ;;  %v211_v40 = vmul.u32 3266489909, %v195_v25 }
  0xb0   :  { %v213_v32 = vmul.u32 3266489909, %v197_v28  ;;  %v1090_v33 = vpop.eup %1089  ;;  %vm1679_vm2 = vmor %vm686_vm15, %vm687_vm1  ;;  %v463_v41 = vmul.f32 1.442695, %v435_v7 }
  0xb1   :  { %v683_v9 = vsub.f32 1.0, %v682_v16  ;;  %1093 = vlog2.f32 %v306_v29  ;;  %v331_v37 = vmul.f32 0.6931472, %v1090_v33  ;;  %v227_v38 = vshrl.u32 %v211_v40, 16  ;;  %v1092_v26 = vpop.eup %1091 }
  0xb2   :  { %v229_v4 = vshrl.u32 %v213_v32, 16 }
  0xb3   :  { %v684_v35 = vmul.f32 %v1088_v20, %v683_v9  ;;  %v352_v43 = vsub.f32 0.0, %v331_v37  ;;  %v243_v61 = vxor.u32 %v227_v38, %v211_v40 }
  0xb4   :  { %v245_v19 = vxor.u32 %v229_v4, %v213_v32 }
  0xb5   :  { %v685_v30 = vadd.f32 %v1088_v20, %v684_v35  ;;  %1095 = vrcp.f32 %v352_v43  ;;  %v259_v22 = vshrl.u32 %v243_v61, 8  ;;  %vm626_vm4 = vweird.f32 %v352_v43 }
  0xb6   :  { %v261_v52 = vshrl.u32 %v245_v19, 8  ;;  %v632_v49 = vand.u32 2147483648, %v352_v43  ;;  %v630_v1 = vand.u32 2147483647, %v352_v43 }
  0xb7   :  { %v689_v46 = vsel %vm1679_vm2, %v1088_v20, %v685_v30  ;;  %v1094_v14 = vpop.eup %1093  ;;  %v275_v45 = vcvt.s32.f32 %v259_v22 }
  0xb8   :  { %v694_v34 = vsel %vm691_vm3, %v693_v17, %v689_v46  ;;  %v335_v54 = vmul.f32 0.6931472, %v1094_v14  ;;  %v277_v3 = vcvt.s32.f32 %v261_v52  ;;  %v633_v16 = vor.u32 1.1754944e-38, %v632_v49  ;;  %v422_v17 = vpop.xlane.xlu0 %421 }
  0xb9   :  { %v1688_v39 = vmul.f32 %v1092_v26, %v694_v34  ;;  %v291_v53 = vmul.f32 5.9604645e-08, %v275_v45  ;;  %vm631_vm7 = vcmp.eq.f32.partialorder %v630_v1, 8.507059e+37  ;;  %v1150_v26 = vld [vmem:[%s1886_s1 + $0x68] sm:$0xff]  ;;  %v438_v34 = vsub.f32 %v1151_v50, %v422_v17 }
  0xba   :  { %v354_v60 = vsub.f32 0.0, %v335_v54  ;;  %v293_v36 = vmul.f32 5.9604645e-08, %v277_v3  ;;  %v436_v55 = vsub.f32 %v1150_v26, %v416_v15 }
  0xbb   :  { %v753_v57 = vsel %vm374_vm0, %v1688_v39, 0.0  ;;  %v1096_v42 = vpop.eup %1095  ;;  %v307_v51 = vmax.f32 %v291_v53, 1e-10  ;;  %v469_v27 = vmul.f32 1.442695, %v438_v34 }
  0xbc   :  { %754 = vadd.xlane.f32.xlu0 %v753_v57  ;;  %1097 = vrcp.f32 %v354_v60  ;;  %v622_v58 = vmul.f32 %v1096_v42, %v352_v43  ;;  %v309_v2 = vmax.f32 %v293_v36, 1e-10  ;;  %vm627_vm5 = vweird.f32 %v1096_v42 }
  0xbd   :  { %1099 = vpow2.f32 %v459_v59  ;;  %vm1695_vm6 = vmor %vm626_vm4, %vm627_vm5  ;;  %vm656_vm8 = vweird.f32 %v354_v60  ;;  %v662_v28 = vand.u32 2147483648, %v354_v60  ;;  %v660_v32 = vand.u32 2147483647, %v354_v60 }
  0xbe   :  { %v623_v5 = vsub.f32 1.0, %v622_v58  ;;  %1101 = vlog2.f32 %v307_v51  ;;  %v465_v52 = vmul.f32 1.442695, %v436_v55 }
  0xbf   :  { %1103 = vlog2.f32 %v309_v2  ;;  %v663_v30 = vor.u32 1.1754944e-38, %v662_v28  ;;  %vm661_vm11 = vcmp.eq.f32.partialorder %v660_v32, 8.507059e+37 }
  0xc0   :  { %v624_v20 = vmul.f32 %v1096_v42, %v623_v5  ;;  %1105 = vpow2.f32 %v463_v41 }
  0xc2   :  { %v1098_v8 = vpop.eup %1097  ;;  %v625_v18 = vadd.f32 %v1096_v42, %v624_v20 }
  0xc3   :  { %v652_v24 = vmul.f32 %v1098_v8, %v354_v60  ;;  %v1100_v25 = vpop.eup %1099  ;;  %vm657_vm9 = vweird.f32 %v1098_v8 }
  0xc4   :  { %v1102_v9 = vpop.eup %1101  ;;  %v629_v29 = vsel %vm1695_vm6, %v1096_v42, %v625_v18  ;;  %vm658_vm10 = vmor %vm656_vm8, %vm657_vm9 }
  0xc5   :  { %v653_v40 = vsub.f32 1.0, %v652_v24  ;;  %v1104_v33 = vpop.eup %1103  ;;  %v634_v35 = vsel %vm631_vm7, %v633_v16, %v629_v29  ;;  %v337_v31 = vmul.f32 0.6931472, %v1102_v9 }
  0xc6   :  { %v1701_v37 = vmul.f32 %v1100_v25, %v634_v35  ;;  %v341_v4 = vmul.f32 0.6931472, %v1104_v33  ;;  %v1106_v47 = vpop.eup %1105 }
  0xc7   :  { %v654_v38 = vmul.f32 %v1098_v8, %v653_v40  ;;  %v355_v43 = vsub.f32 0.0, %v337_v31 }
  0xc8   :  { %v741_v61 = vsel %vm374_vm0, %v1701_v37, 0.0  ;;  %v357_v46 = vsub.f32 0.0, %v341_v4 }
  0xc9   :  { %v655_v19 = vadd.f32 %v1098_v8, %v654_v38  ;;  %742 = vadd.xlane.f32.xlu2 %v741_v61  ;;  %1107 = vrcp.f32 %v355_v43  ;;  %vm671_vm12 = vweird.f32 %v355_v43  ;;  %v677_v60 = vand.u32 2147483648, %v355_v43 }
  0xca   :  { %1109 = vrcp.f32 %v357_v46  ;;  %v675_v42 = vand.u32 2147483647, %v355_v43  ;;  %v707_v6 = vand.u32 2147483648, %v357_v46  ;;  %vm701_vm14 = vweird.f32 %v357_v46 }
  0xcb   :  { %v659_v14 = vsel %vm658_vm10, %v1098_v8, %v655_v19  ;;  %1111 = vpow2.f32 %v465_v52  ;;  %v705_v58 = vand.u32 2147483647, %v357_v46  ;;  %v678_v2 = vor.u32 1.1754944e-38, %v677_v60 }
  0xcc   :  { %v664_v22 = vsel %vm661_vm11, %v663_v30, %v659_v14  ;;  %1113 = vpow2.f32 %v469_v27  ;;  %vm676_vm2 = vcmp.eq.f32.partialorder %v675_v42, 8.507059e+37  ;;  %v708_v41 = vor.u32 1.1754944e-38, %v707_v6 }
  0xcd   :  { %v1712_v54 = vmul.f32 %v1106_v47, %v664_v22  ;;  %vm706_vm4 = vcmp.eq.f32.partialorder %v705_v58, 8.507059e+37 }
  0xcf   :  { %v747_v57 = vsel %vm374_vm0, %v1712_v54, 0.0  ;;  %v1108_v45 = vpop.eup %1107 }
  0xd0   :  { %748 = vadd.xlane.f32.xlu1 %v747_v57  ;;  %v1110_v3 = vpop.eup %1109  ;;  %v667_v59 = vmul.f32 %v1108_v45, %v355_v43  ;;  %vm672_vm13 = vweird.f32 %v1108_v45 }
  0xd1   :  { %v697_v53 = vmul.f32 %v1110_v3, %v357_v46  ;;  %vm702_vm15 = vweird.f32 %v1110_v3  ;;  %vm673_vm1 = vmor %vm671_vm12, %vm672_vm13  ;;  %v1112_v5 = vpop.eup %1111 }
  0xd2   :  { %v668_v36 = vsub.f32 1.0, %v667_v59  ;;  %vm703_vm3 = vmor %vm701_vm14, %vm702_vm15  ;;  %v1114_v20 = vpop.eup %1113 }
  0xd3   :  { %v698_v7 = vsub.f32 1.0, %v697_v53 }
  0xd4   :  { %v669_v51 = vmul.f32 %v1108_v45, %v668_v36 }
  0xd5   :  { %v699_v49 = vmul.f32 %v1110_v3, %v698_v7 }
  0xd6   :  { %v670_v1 = vadd.f32 %v1108_v45, %v669_v51 }
  0xd7   :  { %v700_v8 = vadd.f32 %v1110_v3, %v699_v49 }
  0xd8   :  { %v674_v10 = vsel %vm673_vm1, %v1108_v45, %v670_v1 }
  0xd9   :  { %v679_v16 = vsel %vm676_vm2, %v678_v2, %v674_v10  ;;  %v704_v18 = vsel %vm703_vm3, %v1110_v3, %v700_v8 }
  0xda   :  { %v1716_v24 = vmul.f32 %v1112_v5, %v679_v16  ;;  %v709_v25 = vsel %vm706_vm4, %v708_v41, %v704_v18 }
  0xdb   :  { %v1718_v28 = vmul.f32 %v1114_v20, %v709_v25 }
  0xdc   :  { %v750_v9 = vsel %vm374_vm0, %v1716_v24, 0.0 }
  0xdd   :  { %751 = vadd.xlane.f32.xlu2 %v750_v9  ;;  %v756_v15 = vsel %vm374_vm0, %v1718_v28, 0.0 }
  0xde   :  { %757 = vadd.xlane.f32.xlu1 %v756_v15 }
  0xf8   :  { %v719_v29 = vpop.xlane.xlu0 %718 }
  0xf9   :  { %1115 = vrcp.f32 %v719_v29  ;;  %v713_v40 = vpop.xlane.xlu1 %712  ;;  %v798_v55 = vand.u32 2147483647, %v719_v29  ;;  %v800_v30 = vand.u32 2147483648, %v719_v29  ;;  %vm794_vm7 = vweird.f32 %v719_v29 }
  0xfa   :  { %1117 = vrcp.f32 %v713_v40  ;;  %v768_v61 = vand.u32 2147483647, %v713_v40  ;;  %v770_v19 = vand.u32 2147483648, %v713_v40  ;;  %vm764_vm9 = vweird.f32 %v713_v40 }
  0xfb   :  { %vm1733_vm8 = vcmp.eq.f32.partialorder %v798_v55, 8.507059e+37  ;;  %v801_v22 = vor.u32 1.1754944e-38, %v800_v30 }
  0xfc   :  { %vm1737_vm11 = vcmp.eq.f32.partialorder %v768_v61, 8.507059e+37  ;;  %v771_v57 = vor.u32 1.1754944e-38, %v770_v19 }
  0xff   :  { %v1116_v32 = vpop.eup %1115 }
 0x100   :  { %v1118_v33 = vpop.eup %1117  ;;  %v790_v35 = vmul.f32 %v1116_v32, %v719_v29  ;;  %v1724_v31 = vpop.xlane.xlu0 %727  ;;  %vm795_vm5 = vweird.f32 %v1116_v32 }
 0x101   :  { %v760_v17 = vmul.f32 %v1118_v33, %v713_v40  ;;  %1119 = vrcp.f32 %v1724_v31  ;;  %v1729_v4 = vpop.xlane.xlu1 %721  ;;  %vm765_vm6 = vweird.f32 %v1118_v33  ;;  %vm796_vm10 = vmor %vm794_vm7, %vm795_vm5  ;;  %vm839_vm13 = vweird.f32 %v1724_v31 }
 0x102   :  { %v1727_v38 = vpop.xlane.xlu2 %715  ;;  %v791_v26 = vsub.f32 1.0, %v790_v35  ;;  %vm766_vm12 = vmor %vm764_vm9, %vm765_vm6  ;;  %v843_v60 = vand.u32 2147483647, %v1724_v31  ;;  %v845_v6 = vand.u32 2147483648, %v1724_v31  ;;  %v815_v15 = vand.u32 2147483648, %v1729_v4 }
 0x103   :  { %1121 = vrcp.f32 %v1727_v38  ;;  %v761_v43 = vsub.f32 1.0, %v760_v17  ;;  %vm779_vm14 = vweird.f32 %v1727_v38  ;;  %v783_v20 = vand.u32 2147483647, %v1727_v38 }
 0x104   :  { %v792_v46 = vmul.f32 %v1116_v32, %v791_v26  ;;  %1123 = vrcp.f32 %v1729_v4  ;;  %v785_v10 = vand.u32 2147483648, %v1727_v38  ;;  %vm844_vm2 = vcmp.eq.f32.partialorder %v843_v60, 8.507059e+37 }
 0x105   :  { %v762_v47 = vmul.f32 %v1118_v33, %v761_v43  ;;  %v846_v9 = vor.u32 1.1754944e-38, %v845_v6  ;;  %vm784_vm6 = vcmp.eq.f32.partialorder %v783_v20, 8.507059e+37  ;;  %vm809_vm7 = vweird.f32 %v1729_v4 }
 0x106   :  { %v793_v50 = vadd.f32 %v1116_v32, %v792_v46  ;;  %v786_v35 = vor.u32 1.1754944e-38, %v785_v10  ;;  %v816_v61 = vor.u32 1.1754944e-38, %v815_v15 }
 0x107   :  { %v1120_v14 = vpop.eup %1119  ;;  %v763_v52 = vadd.f32 %v1118_v33, %v762_v47 }
 0x108   :  { %v797_v3 = vsel %vm796_vm10, %v1116_v32, %v793_v50  ;;  %v835_v59 = vmul.f32 %v1120_v14, %v1724_v31  ;;  %v1744_v53 = vpop.xlane.xlu0 %736  ;;  %vm840_vm15 = vweird.f32 %v1120_v14  ;;  %v813_v32 = vand.u32 2147483647, %v1729_v4 }
 0x109   :  { %v1122_v45 = vpop.eup %1121  ;;  %v802_v36 = vsel %vm1733_vm8, %v801_v22, %v797_v3  ;;  %v767_v42 = vsel %vm766_vm12, %v1118_v33, %v763_v52  ;;  %1125 = vrcp.f32 %v1744_v53  ;;  %v1770_v18 = vpop.xlane.xlu1 %730  ;;  %vm841_vm3 = vmor %vm839_vm13, %vm840_vm15  ;;  %vm884_vm10 = vweird.f32 %v1744_v53 }
 0x10a   :  { %v775_v7 = vmul.f32 %v1122_v45, %v1727_v38  ;;  %v1124_v58 = vpop.eup %1123  ;;  %v803_v51 = vmul.f32 %v802_v36, %v1534_v63  ;;  %v772_v2 = vsel %vm1737_vm11, %v771_v57, %v767_v42  ;;  %v836_v49 = vsub.f32 1.0, %v835_v59  ;;  %v1754_v5 = vpop.xlane.xlu2 %724 }
 0x10b   :  { %v773_v1 = vmul.f32 %v772_v2, %v1544_v11  ;;  %v805_v8 = vmul.f32 %v1124_v58, %v1729_v4  ;;  %vm780_vm1 = vweird.f32 %v1122_v45  ;;  %1127 = vrcp.f32 %v1754_v5 }
 0x10c   :  { %v776_v41 = vsub.f32 1.0, %v775_v7  ;;  %1001 = vst.msk [vmem:[%s1888_s2 + $0x10] sm:$0xff] %vm374_vm0, %v803_v51  ;;  %v837_v63 = vmul.f32 %v1120_v14, %v836_v49  ;;  %vm810_vm4 = vweird.f32 %v1124_v58  ;;  %vm781_vm5 = vmor %vm779_vm14, %vm780_vm1  ;;  %1129 = vrcp.f32 %v1770_v18 }
 0x10d   :  { %999 = vst.msk [vmem:[%s1888_s2] sm:$0xff] %vm374_vm0, %v773_v1  ;;  %v806_v16 = vsub.f32 1.0, %v805_v8  ;;  %vm811_vm8 = vmor %vm809_vm7, %vm810_vm4  ;;  %vm814_vm9 = vcmp.eq.f32.partialorder %v813_v32, 8.507059e+37  ;;  %v890_v27 = vand.u32 2147483648, %v1744_v53  ;;  %v830_v3 = vand.u32 2147483648, %v1754_v5 }
 0x10e   :  { %v777_v11 = vmul.f32 %v1122_v45, %v776_v41  ;;  %v838_v25 = vadd.f32 %v1120_v14, %v837_v63  ;;  %vm824_vm14 = vweird.f32 %v1754_v5  ;;  %v858_v7 = vand.u32 2147483647, %v1770_v18 }
 0x10f   :  { %v807_v40 = vmul.f32 %v1124_v58, %v806_v16  ;;  %v1126_v31 = vpop.eup %1125  ;;  %v860_v2 = vand.u32 2147483648, %v1770_v18  ;;  %v831_v41 = vor.u32 1.1754944e-38, %v830_v3  ;;  %vm854_vm4 = vweird.f32 %v1770_v18 }
 0x110   :  { %v778_v29 = vadd.f32 %v1122_v45, %v777_v11  ;;  %v842_v33 = vsel %vm841_vm3, %v1120_v14, %v838_v25  ;;  %v1781_v19 = vpop.xlane.xlu0 %745  ;;  %v880_v50 = vmul.f32 %v1126_v31, %v1744_v53  ;;  %vm885_vm11 = vweird.f32 %v1126_v31 }
 0x111   :  { %v847_v17 = vsel %vm844_vm2, %v846_v9, %v842_v33  ;;  %v808_v55 = vadd.f32 %v1124_v58, %v807_v40  ;;  %v1128_v46 = vpop.eup %1127  ;;  %1131 = vrcp.f32 %v1781_v19  ;;  %vm886_vm15 = vmor %vm884_vm10, %vm885_vm11  ;;  %v861_v9 = vor.u32 1.1754944e-38, %v860_v2 }
 0x112   :  { %v782_v26 = vsel %vm781_vm5, %v1122_v45, %v778_v29  ;;  %v848_v30 = vmul.f32 %v847_v17, %v1568_v48  ;;  %v888_v48 = vand.u32 2147483647, %v1744_v53  ;;  %v820_v34 = vmul.f32 %v1128_v46, %v1754_v5  ;;  %v1130_v52 = vpop.eup %1129 }
 0x113   :  { %v787_v43 = vsel %vm784_vm6, %v786_v35, %v782_v26  ;;  %v812_v47 = vsel %vm811_vm8, %v1124_v58, %v808_v55  ;;  %v881_v14 = vsub.f32 1.0, %v880_v50  ;;  %v828_v45 = vand.u32 2147483647, %v1754_v5 }
 0x114   :  { %v788_v38 = vmul.f32 %v787_v43, %v1585_v56  ;;  %1004 = vst.msk [vmem:[%s1888_s2 + $0x28] sm:$0xff] %vm374_vm0, %v848_v30  ;;  %v817_v4 = vsel %vm814_vm9, %v816_v61, %v812_v47  ;;  %v1798_v22 = vpop.xlane.xlu2 %733  ;;  %v821_v57 = vsub.f32 1.0, %v820_v34  ;;  %v850_v59 = vmul.f32 %v1130_v52, %v1770_v18 }
 0x115   :  { %v818_v56 = vmul.f32 %v817_v4, %v1580_v44  ;;  %v882_v44 = vmul.f32 %v1126_v31, %v881_v14  ;;  %1133 = vrcp.f32 %v1798_v22  ;;  %vm1809_vm12 = vcmp.eq.f32.partialorder %v888_v48, 8.507059e+37 }
 0x116   :  { %1000 = vst.msk [vmem:[%s1888_s2 + $0x8] sm:$0xff] %vm374_vm0, %v788_v38  ;;  %v822_v36 = vmul.f32 %v1128_v46, %v821_v57  ;;  %vm825_vm13 = vweird.f32 %v1128_v46  ;;  %v851_v6 = vsub.f32 1.0, %v850_v59  ;;  %v891_v58 = vor.u32 1.1754944e-38, %v890_v27 }
 0x117   :  { %1002 = vst.msk [vmem:[%s1888_s2 + $0x18] sm:$0xff] %vm374_vm0, %v818_v56  ;;  %v883_v42 = vadd.f32 %v1126_v31, %v882_v44  ;;  %vm829_vm1 = vcmp.eq.f32.partialorder %v828_v45, 8.507059e+37  ;;  %v1132_v49 = vpop.eup %1131  ;;  %vm826_vm2 = vmor %vm824_vm14, %vm825_vm13  ;;  %vm855_vm3 = vweird.f32 %v1130_v52  ;;  %vm859_vm5 = vcmp.eq.f32.partialorder %v858_v7, 8.507059e+37 }
 0x118   :  { %v823_v51 = vadd.f32 %v1128_v46, %v822_v36  ;;  %v852_v20 = vmul.f32 %v1130_v52, %v851_v6  ;;  %v925_v53 = vmul.f32 %v1132_v49, %v1781_v19  ;;  %vm856_vm6 = vmor %vm854_vm4, %vm855_vm3  ;;  %vm929_vm7 = vweird.f32 %v1781_v19 }
 0x119   :  { %v887_v1 = vsel %vm886_vm15, %v1126_v31, %v883_v42  ;;  %v935_v40 = vand.u32 2147483648, %v1781_v19  ;;  %vm930_vm8 = vweird.f32 %v1132_v49  ;;  %v875_v17 = vand.u32 2147483648, %v1798_v22 }
 0x11a   :  { %v892_v5 = vsel %vm1809_vm12, %v891_v58, %v887_v1  ;;  %v827_v8 = vsel %vm826_vm2, %v1128_v46, %v823_v51  ;;  %v853_v16 = vadd.f32 %v1130_v52, %v852_v20  ;;  %v926_v15 = vsub.f32 1.0, %v925_v53  ;;  %vm931_vm10 = vmor %vm929_vm7, %vm930_vm8 }
 0x11b   :  { %v1134_v63 = vpop.eup %1133  ;;  %v893_v10 = vmul.f32 %v892_v5, %v1615_v0  ;;  %v832_v11 = vsel %vm829_vm1, %v831_v41, %v827_v8  ;;  %v933_v0 = vand.u32 2147483647, %v1781_v19  ;;  %v873_v31 = vand.u32 2147483647, %v1798_v22 }
 0x11c   :  { %v833_v25 = vmul.f32 %v832_v11, %v1563_v12  ;;  %v865_v29 = vmul.f32 %v1134_v63, %v1798_v22  ;;  %v857_v18 = vsel %vm856_vm6, %v1130_v52, %v853_v16  ;;  %v927_v32 = vmul.f32 %v1132_v49, %v926_v15 }
 0x11d   :  { %1007 = vst.msk [vmem:[%s1888_s2 + $0x40] sm:$0xff] %vm374_vm0, %v893_v10  ;;  %v862_v12 = vsel %vm859_vm5, %v861_v9, %v857_v18  ;;  %vm870_vm9 = vweird.f32 %v1134_v63  ;;  %vm934_vm11 = vcmp.eq.f32.partialorder %v933_v0, 8.507059e+37  ;;  %v936_v30 = vor.u32 1.1754944e-38, %v935_v40 }
 0x11e   :  { %1003 = vst.msk [vmem:[%s1888_s2 + $0x20] sm:$0xff] %vm374_vm0, %v833_v25  ;;  %v866_v33 = vsub.f32 1.0, %v865_v29  ;;  %v863_v35 = vmul.f32 %v862_v12, %v1618_v21  ;;  %v928_v26 = vadd.f32 %v1132_v49, %v927_v32  ;;  %vm869_vm12 = vweird.f32 %v1798_v22 }
 0x11f   :  { %vm871_vm13 = vmor %vm869_vm12, %vm870_vm9  ;;  %v876_v38 = vor.u32 1.1754944e-38, %v875_v17  ;;  %vm874_vm14 = vcmp.eq.f32.partialorder %v873_v31, 8.507059e+37 }
 0x120   :  { %v867_v55 = vmul.f32 %v1134_v63, %v866_v33  ;;  %1005 = vst.msk [vmem:[%s1888_s2 + $0x30] sm:$0xff] %vm374_vm0, %v863_v35  ;;  %v740_v43 = vpop.xlane.xlu1 %739  ;;  %v932_v61 = vsel %vm931_vm10, %v1132_v49, %v928_v26 }
 0x121   :  { %1135 = vrcp.f32 %v740_v43  ;;  %v937_v46 = vsel %vm934_vm11, %v936_v30, %v932_v61  ;;  %v905_v14 = vand.u32 2147483648, %v740_v43  ;;  %v903_v22 = vand.u32 2147483647, %v740_v43 }
 0x122   :  { %v868_v21 = vadd.f32 %v1134_v63, %v867_v55  ;;  %v938_v47 = vmul.f32 %v937_v46, %v1641_v13  ;;  %vm899_vm1 = vweird.f32 %v740_v43 }
 0x123   :  { %v906_v27 = vor.u32 1.1754944e-38, %v905_v14  ;;  %vm904_vm3 = vcmp.eq.f32.partialorder %v903_v22, 8.507059e+37 }
 0x124   :  { %v872_v50 = vsel %vm871_vm13, %v1134_v63, %v868_v21  ;;  %1010 = vst.msk [vmem:[%s1888_s2 + $0x58] sm:$0xff] %vm374_vm0, %v938_v47 }
 0x125   :  { %v877_v4 = vsel %vm874_vm14, %v876_v38, %v872_v50 }
 0x126   :  { %v878_v19 = vmul.f32 %v877_v4, %v1655_v23 }
 0x127   :  { %v1136_v48 = vpop.eup %1135 }
 0x128   :  { %1006 = vst.msk [vmem:[%s1888_s2 + $0x38] sm:$0xff] %vm374_vm0, %v878_v19  ;;  %v895_v34 = vmul.f32 %v1136_v48, %v740_v43  ;;  %vm900_vm15 = vweird.f32 %v1136_v48 }
 0x129   :  { %vm901_vm2 = vmor %vm899_vm1, %vm900_vm15 }
 0x12a   :  { %v896_v56 = vsub.f32 1.0, %v895_v34 }
 0x12c   :  { %v897_v13 = vmul.f32 %v1136_v48, %v896_v56 }
 0x12e   :  { %v898_v52 = vadd.f32 %v1136_v48, %v897_v13 }
 0x12f   :  { %v755_v57 = vpop.xlane.xlu0 %754 }
 0x130   :  { %v902_v45 = vsel %vm901_vm2, %v1136_v48, %v898_v52  ;;  %1137 = vrcp.f32 %v755_v57  ;;  %v980_v36 = vand.u32 2147483648, %v755_v57  ;;  %vm974_vm4 = vweird.f32 %v755_v57 }
 0x131   :  { %v907_v23 = vsel %vm904_vm3, %v906_v27, %v902_v45  ;;  %v978_v6 = vand.u32 2147483647, %v755_v57 }
 0x132   :  { %v908_v3 = vmul.f32 %v907_v23, %v1675_v62  ;;  %v981_v58 = vor.u32 1.1754944e-38, %v980_v36 }
 0x133   :  { %vm979_vm7 = vcmp.eq.f32.partialorder %v978_v6, 8.507059e+37 }
 0x134   :  { %1008 = vst.msk [vmem:[%s1888_s2 + $0x48] sm:$0xff] %vm374_vm0, %v908_v3 }
 0x136   :  { %v1138_v44 = vpop.eup %1137 }
 0x137   :  { %v970_v59 = vmul.f32 %v1138_v44, %v755_v57  ;;  %vm975_vm5 = vweird.f32 %v1138_v44 }
 0x138   :  { %vm976_vm6 = vmor %vm974_vm4, %vm975_vm5 }
 0x139   :  { %v971_v60 = vsub.f32 1.0, %v970_v59 }
 0x13b   :  { %v972_v42 = vmul.f32 %v1138_v44, %v971_v60 }
 0x13c   :  { %v743_v2 = vpop.xlane.xlu2 %742 }
 0x13d   :  { %v973_v7 = vadd.f32 %v1138_v44, %v972_v42  ;;  %1139 = vrcp.f32 %v743_v2  ;;  %v920_v8 = vand.u32 2147483648, %v743_v2  ;;  %v918_v63 = vand.u32 2147483647, %v743_v2 }
 0x13e   :  { %vm914_vm9 = vweird.f32 %v743_v2 }
 0x13f   :  { %v977_v51 = vsel %vm976_vm6, %v1138_v44, %v973_v7  ;;  %vm919_vm11 = vcmp.eq.f32.partialorder %v918_v63, 8.507059e+37 }
 0x140   :  { %v982_v62 = vsel %vm979_vm7, %v981_v58, %v977_v51 }
 0x141   :  { %v983_v49 = vmul.f32 %v982_v62, %v1688_v39  ;;  %v921_v39 = vor.u32 1.1754944e-38, %v920_v8 }
 0x143   :  { %1013 = vst.msk [vmem:[%s1888_s2 + $0x70] sm:$0xff] %vm374_vm0, %v983_v49  ;;  %v749_v1 = vpop.xlane.xlu1 %748  ;;  %v1140_v41 = vpop.eup %1139 }
 0x144   :  { %1141 = vrcp.f32 %v749_v1  ;;  %v910_v20 = vmul.f32 %v1140_v41, %v743_v2  ;;  %vm915_vm8 = vweird.f32 %v1140_v41  ;;  %v950_v29 = vand.u32 2147483648, %v749_v1 }
 0x145   :  { %vm916_vm10 = vmor %vm914_vm9, %vm915_vm8  ;;  %v948_v40 = vand.u32 2147483647, %v749_v1  ;;  %vm944_vm13 = vweird.f32 %v749_v1 }
 0x146   :  { %v911_v5 = vsub.f32 1.0, %v910_v20  ;;  %v951_v33 = vor.u32 1.1754944e-38, %v950_v29 }
 0x147   :  { %vm949_vm15 = vcmp.eq.f32.partialorder %v948_v40, 8.507059e+37 }
 0x148   :  { %v912_v53 = vmul.f32 %v1140_v41, %v911_v5 }
 0x14a   :  { %v1142_v10 = vpop.eup %1141  ;;  %v913_v11 = vadd.f32 %v1140_v41, %v912_v53 }
 0x14b   :  { %v940_v16 = vmul.f32 %v1142_v10, %v749_v1  ;;  %vm945_vm12 = vweird.f32 %v1142_v10 }
 0x14c   :  { %v917_v25 = vsel %vm916_vm10, %v1140_v41, %v913_v11  ;;  %vm946_vm14 = vmor %vm944_vm13, %vm945_vm12 }
 0x14d   :  { %v941_v9 = vsub.f32 1.0, %v940_v16  ;;  %v922_v15 = vsel %vm919_vm11, %v921_v39, %v917_v25 }
 0x14e   :  { %v923_v18 = vmul.f32 %v922_v15, %v1701_v37 }
 0x14f   :  { %v942_v0 = vmul.f32 %v1142_v10, %v941_v9 }
 0x150   :  { %1009 = vst.msk [vmem:[%s1888_s2 + $0x50] sm:$0xff] %vm374_vm0, %v923_v18  ;;  %v752_v32 = vpop.xlane.xlu2 %751 }
 0x151   :  { %v943_v12 = vadd.f32 %v1142_v10, %v942_v0  ;;  %1143 = vrcp.f32 %v752_v32  ;;  %v758_v35 = vpop.xlane.xlu1 %757  ;;  %v965_v21 = vand.u32 2147483648, %v752_v32  ;;  %v963_v47 = vand.u32 2147483647, %v752_v32 }
 0x152   :  { %1145 = vrcp.f32 %v758_v35  ;;  %v995_v50 = vand.u32 2147483648, %v758_v35  ;;  %v993_v19 = vand.u32 2147483647, %v758_v35  ;;  %vm959_vm3 = vweird.f32 %v752_v32 }
 0x153   :  { %v947_v17 = vsel %vm946_vm14, %v1142_v10, %v943_v12  ;;  %v966_v48 = vor.u32 1.1754944e-38, %v965_v21  ;;  %vm989_vm5 = vweird.f32 %v758_v35  ;;  %vm964_vm6 = vcmp.eq.f32.partialorder %v963_v47, 8.507059e+37 }
 0x154   :  { %v952_v26 = vsel %vm949_vm15, %v951_v33, %v947_v17  ;;  %v996_v14 = vor.u32 1.1754944e-38, %v995_v50  ;;  %vm994_vm8 = vcmp.eq.f32.partialorder %v993_v19, 8.507059e+37 }
 0x155   :  { %v953_v37 = vmul.f32 %v952_v26, %v1712_v54 }
 0x157   :  { %1011 = vst.msk [vmem:[%s1888_s2 + $0x60] sm:$0xff] %vm374_vm0, %v953_v37  ;;  %v1144_v55 = vpop.eup %1143 }
 0x158   :  { %v1146_v31 = vpop.eup %1145  ;;  %v955_v30 = vmul.f32 %v1144_v55, %v752_v32  ;;  %vm960_vm1 = vweird.f32 %v1144_v55 }
 0x159   :  { %v985_v43 = vmul.f32 %v1146_v31, %v758_v35  ;;  %vm990_vm2 = vweird.f32 %v1146_v31  ;;  %vm961_vm4 = vmor %vm959_vm3, %vm960_vm1 }
 0x15a   :  { %v956_v61 = vsub.f32 1.0, %v955_v30  ;;  %vm991_vm7 = vmor %vm989_vm5, %vm990_vm2 }
 0x15b   :  { %v986_v46 = vsub.f32 1.0, %v985_v43 }
 0x15c   :  { %v957_v38 = vmul.f32 %v1144_v55, %v956_v61 }
 0x15d   :  { %v987_v4 = vmul.f32 %v1146_v31, %v986_v46 }
 0x15e   :  { %v958_v54 = vadd.f32 %v1144_v55, %v957_v38 }
 0x15f   :  { %v988_v34 = vadd.f32 %v1146_v31, %v987_v4 }
 0x160   :  { %v962_v56 = vsel %vm961_vm4, %v1144_v55, %v958_v54 }
 0x161   :  { %v967_v13 = vsel %vm964_vm6, %v966_v48, %v962_v56  ;;  %v992_v22 = vsel %vm991_vm7, %v1146_v31, %v988_v34 }
 0x162   :  { %v968_v52 = vmul.f32 %v967_v13, %v1716_v24  ;;  %v997_v27 = vsel %vm994_vm8, %v996_v14, %v992_v22 }
 0x163   :  { %v998_v57 = vmul.f32 %v997_v27, %v1718_v28 }
 0x164   :  { %1012 = vst.msk [vmem:[%s1888_s2 + $0x68] sm:$0xff] %vm374_vm0, %v968_v52 }
 0x165   :  { %1014 = vst.msk [vmem:[%s1888_s2 + $0x78] sm:$0xff] %vm374_vm0, %v998_v57 }

</bundles_post_ra>
